<compile_context>
chip_gen: v5e
topology: v5e:2x2
jax: 0.10.0
libtpu: 0.0.40
codegen_flags: <defaults>
</compile_context>

<pallas_src>
import jax
import jax.numpy as jnp
import numpy as np
from jax.experimental import pallas as pl
from jax.experimental.pallas import tpu as pltpu

# ---------------- synthetic class_info / module sizes (small) ----------------
NUM_CONTINENT = 6
NUM_COUNTRY = 8
NUM_STATE = 8
NUM_CITY = 10
INPUT_SIZE = NUM_CONTINENT + NUM_COUNTRY + NUM_STATE + NUM_CITY  # 32 == seq len L

IN_CHANNELS = 3
N_FEATURES = 32          # VideoMAE.n_features, scaled down for this synthetic run
EMBED_DIM = 6
HEAD_COUNT = 2
HEAD_DIM = EMBED_DIM // HEAD_COUNT
N_SCENES = 16
TEXT_DIM = 512
TEXT_HIDDEN = 466
TEXT_HIDDEN_PAD = 512    # padded to a multiple of 128 for unmasked lane tiles
HIDDEN = [256, 128, 64, 32, 16]

# ------------- packed-parameter slab layouts (host packer == kernel) ----------
F32_SLAB_WIDTH = 512
ROW_WBB = 0      # rows 0:3   [3, 32]   backbone Linear weight
ROW_BBB = 4      # row  4     [1, 32]   backbone Linear bias
ROW_WCAT = 8     # rows 8:40  [32, 32]  fused 4-head classifier weight
ROW_BCAT = 40    # row  40    [1, 32]   fused classifier bias
ROW_BMLP0 = 41   # rows 41:47 scene-MLP biases b0..b5
ROW_BT0 = 47     # row  47    [1, 512]  text-head bias 0 (padded)
ROW_BT1 = 48     # row  48    [1, 512]  text-head bias 1
F32_SLAB_ROWS = 56

MLP_DIMS = [INPUT_SIZE] + HIDDEN + [N_SCENES]   # [32, 256, 128, 64, 32, 16, 16]
MLP_ROW_OFFSETS = []
_r = 0
for _d in MLP_DIMS[:-1]:
    MLP_ROW_OFFSETS.append(_r)
    _r += _d
MLP_SLAB_ROWS = _r       # 528 (multiple of 16 -> clean bf16 sublane tiles)
MLP_SLAB_WIDTH = 256

OUT_CS_WIDTH = 128       # lane-dense packed (catted | scene | zero-pad) output
N_ATTN_SCALARS = 16      # 6 per head * 2 heads + b_of (+ padding)


# ------------------------------- fused kernel ---------------------------------
def fused_kernel(x_ref, slab_ref, attn_ref, mlp_ref, wt0_ref, wt1_ref,
                 cs_ref, text_ref):
    f32 = jnp.float32

    # ---- backbone stub: mean pool over flattened (T,H,W) + Linear(C, F) -----
    # TODO(synk): the real VideoMAE backbone is external/undefined; replaced by
    # mean-pool + Linear.  For production-size video the S axis must be
    # grid-tiled (reduction axis last, "arbitrary", VMEM accumulator) and the
    # tile sized for v7x's 64 MiB VMEM, with a "parallel" batch axis for its
    # two TensorCores.
    x = x_ref[...]                                        # [B, C, S]
    pooled = jnp.mean(x, axis=-1)                         # [B, C]
    w_bb = slab_ref[ROW_WBB:ROW_WBB + IN_CHANNELS, 0:N_FEATURES]   # [C, F]
    b_bb = slab_ref[ROW_BBB:ROW_BBB + 1, 0:N_FEATURES]             # [1, F]
    # K == C == 3 contraction stays on the VPU (MXU would be pure fill/drain).
    feat = jnp.sum(pooled[:, :, None] * w_bb[None, :, :], axis=1) + b_bb  # [B, F]

    # ---- 4 classifier heads fused column-wise: (city|state|country|continent)
    w_cat = slab_ref[ROW_WCAT:ROW_WCAT + N_FEATURES, 0:INPUT_SIZE]
    b_cat = slab_ref[ROW_BCAT:ROW_BCAT + 1, 0:INPUT_SIZE]
    cat = jnp.dot(feat, w_cat, preferred_element_type=f32) + b_cat        # [B, L]

    # ---- attention: fully folded rank-1 scalar form (no MXU, no [B,L,6]) ----
    cat_q = cat[:, :, None]                               # [B, L, 1]
    cat_k = cat[:, None, :]                               # [B, 1, L]
    outer = cat_q * cat_k                                 # [B, L, L]
    fin = jnp.zeros_like(cat) + attn_ref[12]              # + b_of
    for h in range(HEAD_COUNT):                           # 2 iters, trace-unrolled
        alpha = attn_ref[6 * h + 0]
        beta = attn_ref[6 * h + 1]
        gamma = attn_ref[6 * h + 2]
        delta = attn_ref[6 * h + 3]
        c1 = attn_ref[6 * h + 4]
        c2 = attn_ref[6 * h + 5]
        s = alpha * outer + beta * cat_q + gamma * cat_k + delta
        s = s - jnp.max(s, axis=-1, keepdims=True)
        p = jnp.exp(s)
        p = p * pl.reciprocal(jnp.sum(p, axis=-1, keepdims=True), approx=True)
        pc = jnp.sum(p * cat_k, axis=-1)                  # [B, L] == p @ cat
        fin = fin + c1 * pc + c2

    # ---- out_linear head: 5 x (Linear + ReLU) + Linear, bf16 w / f32 acc ----
    a = fin
    for i in range(5):
        r = MLP_ROW_OFFSETS[i]
        w = mlp_ref[r:r + MLP_DIMS[i], 0:MLP_DIMS[i + 1]]
        b = slab_ref[ROW_BMLP0 + i:ROW_BMLP0 + i + 1, 0:MLP_DIMS[i + 1]]
        a = jnp.maximum(
            jnp.dot(a.astype(jnp.bfloat16), w, preferred_element_type=f32) + b,
            0.0)
    r = MLP_ROW_OFFSETS[5]
    w5 = mlp_ref[r:r + MLP_DIMS[5], 0:MLP_DIMS[6]]
    b5 = slab_ref[ROW_BMLP0 + 5:ROW_BMLP0 + 6, 0:MLP_DIMS[6]]
    scene = jnp.dot(a.astype(jnp.bfloat16), w5,
                    preferred_element_type=f32) + b5                      # [B, 16]

    # ---- text head: bf16 weights, hidden padded 466->512, f32 accumulation --
    bt0 = slab_ref[ROW_BT0:ROW_BT0 + 1, 0:TEXT_HIDDEN_PAD]
    bt1 = slab_ref[ROW_BT1:ROW_BT1 + 1, 0:TEXT_DIM]
    t = jnp.maximum(
        jnp.dot(fin.astype(jnp.bfloat16), wt0_ref[...],
                preferred_element_type=f32) + bt0, 0.0)
    text_ref[...] = jnp.dot(t.astype(jnp.bfloat16), wt1_ref[...],
                            preferred_element_type=f32) + bt1

    # ---- catted + scene packed into one lane-dense [B, 128] output ----------
    pad = jnp.zeros((cat.shape[0], OUT_CS_WIDTH - INPUT_SIZE - N_SCENES),
                    dtype=f32)
    cs_ref[...] = jnp.concatenate([cat, scene, pad], axis=-1)


# ------------------------------ glue / wrapper --------------------------------
@jax.jit
def forward(x, slab_f32, attn_scalars, mlp_slab, wt0, wt1):
    B = x.shape[0]
    xr = x.reshape(B, x.shape[1], -1)                     # NCTHW -> [B, C, S]
    vmem = pl.BlockSpec(memory_space=pltpu.MemorySpace.VMEM)
    smem = pl.BlockSpec(memory_space=pltpu.MemorySpace.SMEM)
    out_cs, out_text = pl.pallas_call(
        fused_kernel,
        out_shape=(jax.ShapeDtypeStruct((B, OUT_CS_WIDTH), jnp.float32),
                   jax.ShapeDtypeStruct((B, TEXT_DIM), jnp.float32)),
        in_specs=[vmem, vmem, smem, vmem, vmem, vmem],
        out_specs=(vmem, vmem),
    )(xr, slab_f32, attn_scalars, mlp_slab, wt0, wt1)

    catted = out_cs[:, :INPUT_SIZE]
    out_scene = out_cs[:, INPUT_SIZE:INPUT_SIZE + N_SCENES]
    # torch.cat order was (city, state, country, continent) -> slice back out
    c0 = NUM_CITY
    c1 = c0 + NUM_STATE
    c2 = c1 + NUM_COUNTRY
    out_list = [catted[:, :c0], catted[:, c0:c1], catted[:, c1:c2], catted[:, c2:]]
    return out_list, out_scene, out_text


# -------------------- host-side packing / algebraic folding -------------------
def prepare_kernel_params(p):
    pn = {k: np.asarray(v, dtype=np.float32) for k, v in p.items()}

    # -- small-parameter f32 slab: ONE DMA instead of ~20 separate tiny ones --
    slab = np.zeros((F32_SLAB_ROWS, F32_SLAB_WIDTH), np.float32)
    slab[ROW_WBB:ROW_WBB + IN_CHANNELS, 0:N_FEATURES] = pn["w_bb"]
    slab[ROW_BBB, 0:N_FEATURES] = pn["b_bb"][0]
    slab[ROW_WCAT:ROW_WCAT + N_FEATURES, 0:INPUT_SIZE] = pn["w_cat"]
    slab[ROW_BCAT, 0:INPUT_SIZE] = pn["b_cat"][0]
    for i in range(6):
        slab[ROW_BMLP0 + i, 0:MLP_DIMS[i + 1]] = pn[f"b{i}"][0]
    slab[ROW_BT0, 0:TEXT_HIDDEN] = pn["bt0"][0]
    slab[ROW_BT1, 0:TEXT_DIM] = pn["bt1"][0]

    # -- attention: exact fold of Linear(1,E) q/k/v, MHA in-proj, per-head
    #    scaled-dot-product structure, out-proj and final_projection into
    #    6 scalars per head + b_of (uses sum_k softmax == 1) --
    w_qeff = pn["w_q"] @ pn["w_iq"]; b_qeff = pn["b_q"] @ pn["w_iq"] + pn["b_iq"]
    w_keff = pn["w_k"] @ pn["w_ik"]; b_keff = pn["b_k"] @ pn["w_ik"] + pn["b_ik"]
    w_veff = pn["w_v"] @ pn["w_iv"]; b_veff = pn["b_v"] @ pn["w_iv"] + pn["b_iv"]
    w_of = (pn["w_o"] @ pn["w_f"].T).T                               # [1, E]
    b_of = float((pn["b_o"] @ pn["w_f"].T + pn["b_f"])[0, 0])
    scale = 1.0 / (HEAD_DIM ** 0.5)
    attn = np.zeros((N_ATTN_SCALARS,), np.float32)
    for h in range(HEAD_COUNT):
        sl = slice(h * HEAD_DIM, (h + 1) * HEAD_DIM)
        wq, bq = w_qeff[0, sl], b_qeff[0, sl]
        wk, bk = w_keff[0, sl], b_keff[0, sl]
        wv, bv = w_veff[0, sl], b_veff[0, sl]
        wo = w_of[0, sl]
        attn[6 * h + 0] = scale * np.dot(wq, wk)    # alpha
        attn[6 * h + 1] = scale * np.dot(wq, bk)    # beta
        attn[6 * h + 2] = scale * np.dot(bq, wk)    # gamma
        attn[6 * h + 3] = scale * np.dot(bq, bk)    # delta
        attn[6 * h + 4] = np.dot(wv, wo)            # c1
        attn[6 * h + 5] = np.dot(bv, wo)            # c2
    attn[12] = b_of

    # -- scene-MLP weights: one bf16 slab (f32 MXU accumulation in-kernel) --
    mlp = np.zeros((MLP_SLAB_ROWS, MLP_SLAB_WIDTH), np.float32)
    for i in range(6):
        r = MLP_ROW_OFFSETS[i]
        mlp[r:r + MLP_DIMS[i], 0:MLP_DIMS[i + 1]] = pn[f"w{i}"]

    # -- text-head weights: bf16, hidden zero-padded 466 -> 512 --
    wt0 = np.zeros((INPUT_SIZE, TEXT_HIDDEN_PAD), np.float32)
    wt0[:, 0:TEXT_HIDDEN] = pn["wt0"]
    wt1 = np.zeros((TEXT_HIDDEN_PAD, TEXT_DIM), np.float32)
    wt1[0:TEXT_HIDDEN, :] = pn["wt1"]

    return (jnp.asarray(slab),
            jnp.asarray(attn),
            jnp.asarray(mlp, dtype=jnp.bfloat16),
            jnp.asarray(wt0, dtype=jnp.bfloat16),
            jnp.asarray(wt1, dtype=jnp.bfloat16))


# --------------------------- pure-JAX reference -------------------------------
def reference(x, p):
    B = x.shape[0]
    pooled = x.reshape(B, x.shape[1], -1).mean(axis=2)
    feat = pooled @ p["w_bb"] + p["b_bb"]
    catted = feat @ p["w_cat"] + p["b_cat"]

    xq = catted[..., None]
    q = xq * p["w_q"] + p["b_q"]
    k = xq * p["w_k"] + p["b_k"]
    v = xq * p["w_v"] + p["b_v"]
    Q = jnp.einsum("ble,ef->blf", q, p["w_iq"]) + p["b_iq"]
    K = jnp.einsum("ble,ef->blf", k, p["w_ik"]) + p["b_ik"]
    V = jnp.einsum("ble,ef->blf", v, p["w_iv"]) + p["b_iv"]
    scale = 1.0 / (HEAD_DIM ** 0.5)
    ctxs = []
    for h in range(HEAD_COUNT):
        sl = slice(h * HEAD_DIM, (h + 1) * HEAD_DIM)
        s = jnp.einsum("bqd,bkd->bqk", Q[..., sl], K[..., sl]) * scale
        pr = jax.nn.softmax(s, axis=-1)
        ctxs.append(jnp.einsum("bqk,bkd->bqd", pr, V[..., sl]))
    ctx = jnp.concatenate(ctxs, axis=-1)
    attn_out = jnp.einsum("ble,ef->blf", ctx, p["w_o"]) + p["b_o"]
    fin = jnp.sum(attn_out * p["w_f"], axis=-1) + p["b_f"]

    a = fin
    for w, b in ((p["w0"], p["b0"]), (p["w1"], p["b1"]), (p["w2"], p["b2"]),
                 (p["w3"], p["b3"]), (p["w4"], p["b4"])):
        a = jnp.maximum(a @ w + b, 0.0)
    scene = a @ p["w5"] + p["b5"]
    t = jnp.maximum(fin @ p["wt0"] + p["bt0"], 0.0)
    text = t @ p["wt1"] + p["bt1"]

    c0 = NUM_CITY
    c1 = c0 + NUM_STATE
    c2 = c1 + NUM_COUNTRY
    return ([catted[:, :c0], catted[:, c0:c1], catted[:, c1:c2], catted[:, c2:]],
            scene, text)


# ------------------------------ param init ------------------------------------
def init_params(key):
    keys = iter(jax.random.split(key, 64))

    def rnd(shape, scale=0.1):
        return scale * jax.random.normal(next(keys), shape, dtype=jnp.float32)

    p = {}
    p["w_bb"] = rnd((IN_CHANNELS, N_FEATURES))
    p["b_bb"] = rnd((1, N_FEATURES))
    p["w_cat"] = rnd((N_FEATURES, INPUT_SIZE))
    p["b_cat"] = rnd((1, INPUT_SIZE))

    for name in ("q", "k", "v"):
        p[f"w_{name}"] = rnd((1, EMBED_DIM))
        p[f"b_{name}"] = rnd((1, EMBED_DIM))
    for name in ("iq", "ik", "iv", "o"):
        p[f"w_{name}"] = rnd((EMBED_DIM, EMBED_DIM))
        p[f"b_{name}"] = rnd((1, EMBED_DIM))
    p["w_f"] = rnd((1, EMBED_DIM))
    p["b_f"] = rnd((1, 1))

    dims = [INPUT_SIZE] + HIDDEN + [N_SCENES]
    for i in range(6):
        p[f"w{i}"] = rnd((dims[i], dims[i + 1]))
        p[f"b{i}"] = rnd((1, dims[i + 1]))
    p["wt0"] = rnd((INPUT_SIZE, TEXT_HIDDEN))
    p["bt0"] = rnd((1, TEXT_HIDDEN))
    p["wt1"] = rnd((TEXT_HIDDEN, TEXT_DIM))
    p["bt1"] = rnd((1, TEXT_DIM))
    return p


# ---------------------------------- main ---------------------------------------
if __name__ == "__main__":
    key = jax.random.PRNGKey(0)
    kx, kparam_key = jax.random.split(key)
    # x: [B, C, T, H, W]  (PyTorch NCTHW video layout)
    x = jax.random.normal(kx, (2, IN_CHANNELS, 4, 8, 8), dtype=jnp.float32)
    params = init_params(kparam_key)
    kargs = prepare_kernel_params(params)

    out_list, out_scene, out_text = forward(x, *kargs)
    jax.block_until_ready(out_scene)
    jax.block_until_ready(out_text)
    for o in out_list:
        jax.block_until_ready(o)

    ref_list, ref_scene, ref_text = reference(x, params)
    for a, b in zip(out_list, ref_list):
        np.testing.assert_allclose(np.asarray(a), np.asarray(b), rtol=2e-2, atol=2e-2)
    np.testing.assert_allclose(np.asarray(out_scene), np.asarray(ref_scene),
                               rtol=2e-2, atol=2e-2)
    np.testing.assert_allclose(np.asarray(out_text), np.asarray(ref_text),
                               rtol=2e-2, atol=2e-2)

    assert out_scene.shape == (2, N_SCENES)
    assert out_text.shape == (2, TEXT_DIM)
    assert [o.shape for o in out_list] == [(2, NUM_CITY), (2, NUM_STATE),
                                           (2, NUM_COUNTRY), (2, NUM_CONTINENT)]
    print("KERNEL_OK")
</pallas_src>

<mosaic_0001>
module attributes {stable_mosaic.version = 11 : i64} {
  func.func @fused_kernel(%arg0: memref<2x3x256xf32, #tpu.memory_space<vmem>>, %arg1: memref<56x512xf32, #tpu.memory_space<vmem>>, %arg2: memref<16xf32, #tpu.memory_space<smem>>, %arg3: memref<528x256xbf16, #tpu.memory_space<vmem>>, %arg4: memref<32x512xbf16, #tpu.memory_space<vmem>>, %arg5: memref<512x512xbf16, #tpu.memory_space<vmem>>, %arg6: memref<2x128xf32, #tpu.memory_space<vmem>>, %arg7: memref<2x512xf32, #tpu.memory_space<vmem>>) attributes {dimension_semantics = [], scalar_prefetch = 0 : i64, scratch_operands = 0 : i64, tpu.core_type = #tpu.core_type<tc>} {
    %c0 = arith.constant 0 : index
    %c0_0 = arith.constant 0 : index
    %c0_1 = arith.constant 0 : index
    %0 = vector.load %arg0[%c0, %c0_0, %c0_1] : memref<2x3x256xf32, #tpu.memory_space<vmem>>, vector<2x3x256xf32>
    %cst = arith.constant dense<0.000000e+00> : vector<2x3xf32>
    %1 = vector.multi_reduction <add>, %0, %cst [2] : vector<2x3x256xf32> to vector<2x3xf32>
    %cst_2 = arith.constant 2.560000e+02 : f32
    %2 = vector.broadcast %cst_2 : f32 to vector<2x3xf32>
    %3 = arith.divf %1, %2 : vector<2x3xf32>
    %c0_3 = arith.constant 0 : index
    %c0_4 = arith.constant 0 : index
    %4 = vector.load %arg1[%c0_3, %c0_4] : memref<56x512xf32, #tpu.memory_space<vmem>>, vector<3x32xf32>
    %c4 = arith.constant 4 : index
    %c0_5 = arith.constant 0 : index
    %5 = vector.load %arg1[%c4, %c0_5] : memref<56x512xf32, #tpu.memory_space<vmem>>, vector<1x32xf32>
    %6 = vector.shape_cast %3 : vector<2x3xf32> to vector<2x3x1xf32>
    %7 = vector.shape_cast %4 : vector<3x32xf32> to vector<1x3x32xf32>
    %8 = vector.broadcast %6 : vector<2x3x1xf32> to vector<2x3x32xf32>
    %9 = vector.broadcast %7 : vector<1x3x32xf32> to vector<2x3x32xf32>
    %10 = arith.mulf %8, %9 : vector<2x3x32xf32>
    %cst_6 = arith.constant dense<0.000000e+00> : vector<2x32xf32>
    %11 = vector.multi_reduction <add>, %10, %cst_6 [1] : vector<2x3x32xf32> to vector<2x32xf32>
    %12 = vector.broadcast %5 : vector<1x32xf32> to vector<2x32xf32>
    %13 = arith.addf %11, %12 : vector<2x32xf32>
    %c8 = arith.constant 8 : index
    %c0_7 = arith.constant 0 : index
    %14 = vector.load %arg1[%c8, %c0_7] : memref<56x512xf32, #tpu.memory_space<vmem>>, vector<32x32xf32>
    %c40 = arith.constant 40 : index
    %c0_8 = arith.constant 0 : index
    %15 = vector.load %arg1[%c40, %c0_8] : memref<56x512xf32, #tpu.memory_space<vmem>>, vector<1x32xf32>
    %cst_9 = arith.constant dense<0.000000e+00> : vector<2x32xf32>
    %16 = tpu.matmul %13, %14, %cst_9 {dimension_numbers = #tpu.dot_dimension_numbers<[1], [0], [0], [1], [0, 0, 1, 1], [], []>} : vector<2x32xf32>, vector<32x32xf32>, vector<2x32xf32> -> vector<2x32xf32>
    %17 = vector.broadcast %15 : vector<1x32xf32> to vector<2x32xf32>
    %18 = arith.addf %16, %17 : vector<2x32xf32>
    %19 = vector.shape_cast %18 : vector<2x32xf32> to vector<2x32x1xf32>
    %20 = vector.shape_cast %18 : vector<2x32xf32> to vector<2x1x32xf32>
    %21 = vector.broadcast %19 : vector<2x32x1xf32> to vector<2x32x32xf32>
    %22 = vector.broadcast %20 : vector<2x1x32xf32> to vector<2x32x32xf32>
    %23 = arith.mulf %21, %22 : vector<2x32x32xf32>
    %cst_10 = arith.constant 0.000000e+00 : f32
    %24 = vector.broadcast %cst_10 : f32 to vector<2x32xf32>
    %c12 = arith.constant 12 : index
    %25 = memref.load %arg2[%c12] : memref<16xf32, #tpu.memory_space<smem>>
    %26 = vector.broadcast %25 : f32 to vector<2x32xf32>
    %27 = arith.addf %24, %26 : vector<2x32xf32>
    %c0_11 = arith.constant 0 : index
    %28 = memref.load %arg2[%c0_11] : memref<16xf32, #tpu.memory_space<smem>>
    %c1 = arith.constant 1 : index
    %29 = memref.load %arg2[%c1] : memref<16xf32, #tpu.memory_space<smem>>
    %c2 = arith.constant 2 : index
    %30 = memref.load %arg2[%c2] : memref<16xf32, #tpu.memory_space<smem>>
    %c3 = arith.constant 3 : index
    %31 = memref.load %arg2[%c3] : memref<16xf32, #tpu.memory_space<smem>>
    %c4_12 = arith.constant 4 : index
    %32 = memref.load %arg2[%c4_12] : memref<16xf32, #tpu.memory_space<smem>>
    %c5 = arith.constant 5 : index
    %33 = memref.load %arg2[%c5] : memref<16xf32, #tpu.memory_space<smem>>
    %34 = vector.broadcast %28 : f32 to vector<2x32x32xf32>
    %35 = arith.mulf %34, %23 : vector<2x32x32xf32>
    %36 = vector.broadcast %29 : f32 to vector<2x32x1xf32>
    %37 = arith.mulf %36, %19 : vector<2x32x1xf32>
    %38 = vector.broadcast %37 : vector<2x32x1xf32> to vector<2x32x32xf32>
    %39 = arith.addf %35, %38 : vector<2x32x32xf32>
    %40 = vector.broadcast %30 : f32 to vector<2x1x32xf32>
    %41 = arith.mulf %40, %20 : vector<2x1x32xf32>
    %42 = vector.broadcast %41 : vector<2x1x32xf32> to vector<2x32x32xf32>
    %43 = arith.addf %39, %42 : vector<2x32x32xf32>
    %44 = vector.broadcast %31 : f32 to vector<2x32x32xf32>
    %45 = arith.addf %43, %44 : vector<2x32x32xf32>
    %cst_13 = arith.constant dense<0xFF800000> : vector<2x32xf32>
    %46 = vector.multi_reduction <maximumf>, %45, %cst_13 [2] : vector<2x32x32xf32> to vector<2x32xf32>
    %47 = vector.shape_cast %46 : vector<2x32xf32> to vector<2x32x1xf32>
    %48 = vector.broadcast %47 : vector<2x32x1xf32> to vector<2x32x32xf32>
    %49 = arith.subf %45, %48 : vector<2x32x32xf32>
    %50 = math.exp %49 : vector<2x32x32xf32>
    %cst_14 = arith.constant dense<0.000000e+00> : vector<2x32xf32>
    %51 = vector.multi_reduction <add>, %50, %cst_14 [2] : vector<2x32x32xf32> to vector<2x32xf32>
    %52 = vector.shape_cast %51 : vector<2x32xf32> to vector<2x32x1xf32>
    %53 = tpu.reciprocal %52 {approx = true} : vector<2x32x1xf32> -> vector<2x32x1xf32>
    %54 = vector.broadcast %53 : vector<2x32x1xf32> to vector<2x32x32xf32>
    %55 = arith.mulf %50, %54 : vector<2x32x32xf32>
    %56 = vector.broadcast %20 : vector<2x1x32xf32> to vector<2x32x32xf32>
    %57 = arith.mulf %55, %56 : vector<2x32x32xf32>
    %cst_15 = arith.constant dense<0.000000e+00> : vector<2x32xf32>
    %58 = vector.multi_reduction <add>, %57, %cst_15 [2] : vector<2x32x32xf32> to vector<2x32xf32>
    %59 = vector.broadcast %32 : f32 to vector<2x32xf32>
    %60 = arith.mulf %59, %58 : vector<2x32xf32>
    %61 = arith.addf %27, %60 : vector<2x32xf32>
    %62 = vector.broadcast %33 : f32 to vector<2x32xf32>
    %63 = arith.addf %61, %62 : vector<2x32xf32>
    %c6 = arith.constant 6 : index
    %64 = memref.load %arg2[%c6] : memref<16xf32, #tpu.memory_space<smem>>
    %c7 = arith.constant 7 : index
    %65 = memref.load %arg2[%c7] : memref<16xf32, #tpu.memory_space<smem>>
    %c8_16 = arith.constant 8 : index
    %66 = memref.load %arg2[%c8_16] : memref<16xf32, #tpu.memory_space<smem>>
    %c9 = arith.constant 9 : index
    %67 = memref.load %arg2[%c9] : memref<16xf32, #tpu.memory_space<smem>>
    %c10 = arith.constant 10 : index
    %68 = memref.load %arg2[%c10] : memref<16xf32, #tpu.memory_space<smem>>
    %c11 = arith.constant 11 : index
    %69 = memref.load %arg2[%c11] : memref<16xf32, #tpu.memory_space<smem>>
    %70 = vector.broadcast %64 : f32 to vector<2x32x32xf32>
    %71 = arith.mulf %70, %23 : vector<2x32x32xf32>
    %72 = vector.broadcast %65 : f32 to vector<2x32x1xf32>
    %73 = arith.mulf %72, %19 : vector<2x32x1xf32>
    %74 = vector.broadcast %73 : vector<2x32x1xf32> to vector<2x32x32xf32>
    %75 = arith.addf %71, %74 : vector<2x32x32xf32>
    %76 = vector.broadcast %66 : f32 to vector<2x1x32xf32>
    %77 = arith.mulf %76, %20 : vector<2x1x32xf32>
    %78 = vector.broadcast %77 : vector<2x1x32xf32> to vector<2x32x32xf32>
    %79 = arith.addf %75, %78 : vector<2x32x32xf32>
    %80 = vector.broadcast %67 : f32 to vector<2x32x32xf32>
    %81 = arith.addf %79, %80 : vector<2x32x32xf32>
    %cst_17 = arith.constant dense<0xFF800000> : vector<2x32xf32>
    %82 = vector.multi_reduction <maximumf>, %81, %cst_17 [2] : vector<2x32x32xf32> to vector<2x32xf32>
    %83 = vector.shape_cast %82 : vector<2x32xf32> to vector<2x32x1xf32>
    %84 = vector.broadcast %83 : vector<2x32x1xf32> to vector<2x32x32xf32>
    %85 = arith.subf %81, %84 : vector<2x32x32xf32>
    %86 = math.exp %85 : vector<2x32x32xf32>
    %cst_18 = arith.constant dense<0.000000e+00> : vector<2x32xf32>
    %87 = vector.multi_reduction <add>, %86, %cst_18 [2] : vector<2x32x32xf32> to vector<2x32xf32>
    %88 = vector.shape_cast %87 : vector<2x32xf32> to vector<2x32x1xf32>
    %89 = tpu.reciprocal %88 {approx = true} : vector<2x32x1xf32> -> vector<2x32x1xf32>
    %90 = vector.broadcast %89 : vector<2x32x1xf32> to vector<2x32x32xf32>
    %91 = arith.mulf %86, %90 : vector<2x32x32xf32>
    %92 = vector.broadcast %20 : vector<2x1x32xf32> to vector<2x32x32xf32>
    %93 = arith.mulf %91, %92 : vector<2x32x32xf32>
    %cst_19 = arith.constant dense<0.000000e+00> : vector<2x32xf32>
    %94 = vector.multi_reduction <add>, %93, %cst_19 [2] : vector<2x32x32xf32> to vector<2x32xf32>
    %95 = vector.broadcast %68 : f32 to vector<2x32xf32>
    %96 = arith.mulf %95, %94 : vector<2x32xf32>
    %97 = arith.addf %63, %96 : vector<2x32xf32>
    %98 = vector.broadcast %69 : f32 to vector<2x32xf32>
    %99 = arith.addf %97, %98 : vector<2x32xf32>
    %c0_20 = arith.constant 0 : index
    %c0_21 = arith.constant 0 : index
    %100 = vector.load %arg3[%c0_20, %c0_21] : memref<528x256xbf16, #tpu.memory_space<vmem>>, vector<32x256xbf16>
    %c41 = arith.constant 41 : index
    %c0_22 = arith.constant 0 : index
    %101 = vector.load %arg1[%c41, %c0_22] : memref<56x512xf32, #tpu.memory_space<vmem>>, vector<1x256xf32>
    %102 = arith.truncf %99 : vector<2x32xf32> to vector<2x32xbf16>
    %cst_23 = arith.constant dense<0.000000e+00> : vector<2x256xf32>
    %103 = tpu.matmul %102, %100, %cst_23 {dimension_numbers = #tpu.dot_dimension_numbers<[1], [0], [0], [1], [0, 0, 1, 1], [], []>} : vector<2x32xbf16>, vector<32x256xbf16>, vector<2x256xf32> -> vector<2x256xf32>
    %104 = vector.broadcast %101 : vector<1x256xf32> to vector<2x256xf32>
    %105 = arith.addf %103, %104 : vector<2x256xf32>
    %cst_24 = arith.constant 0.000000e+00 : f32
    %106 = vector.broadcast %cst_24 : f32 to vector<2x256xf32>
    %107 = arith.maximumf %105, %106 : vector<2x256xf32>
    %c32 = arith.constant 32 : index
    %c0_25 = arith.constant 0 : index
    %108 = vector.load %arg3[%c32, %c0_25] : memref<528x256xbf16, #tpu.memory_space<vmem>>, vector<256x128xbf16>
    %c42 = arith.constant 42 : index
    %c0_26 = arith.constant 0 : index
    %109 = vector.load %arg1[%c42, %c0_26] : memref<56x512xf32, #tpu.memory_space<vmem>>, vector<1x128xf32>
    %110 = arith.truncf %107 : vector<2x256xf32> to vector<2x256xbf16>
    %cst_27 = arith.constant dense<0.000000e+00> : vector<2x128xf32>
    %111 = tpu.matmul %110, %108, %cst_27 {dimension_numbers = #tpu.dot_dimension_numbers<[1], [0], [0], [1], [0, 0, 1, 1], [], []>} : vector<2x256xbf16>, vector<256x128xbf16>, vector<2x128xf32> -> vector<2x128xf32>
    %112 = vector.broadcast %109 : vector<1x128xf32> to vector<2x128xf32>
    %113 = arith.addf %111, %112 : vector<2x128xf32>
    %cst_28 = arith.constant 0.000000e+00 : f32
    %114 = vector.broadcast %cst_28 : f32 to vector<2x128xf32>
    %115 = arith.maximumf %113, %114 : vector<2x128xf32>
    %c288 = arith.constant 288 : index
    %c0_29 = arith.constant 0 : index
    %116 = vector.load %arg3[%c288, %c0_29] : memref<528x256xbf16, #tpu.memory_space<vmem>>, vector<128x64xbf16>
    %c43 = arith.constant 43 : index
    %c0_30 = arith.constant 0 : index
    %117 = vector.load %arg1[%c43, %c0_30] : memref<56x512xf32, #tpu.memory_space<vmem>>, vector<1x64xf32>
    %118 = arith.truncf %115 : vector<2x128xf32> to vector<2x128xbf16>
    %cst_31 = arith.constant dense<0.000000e+00> : vector<2x64xf32>
    %119 = tpu.matmul %118, %116, %cst_31 {dimension_numbers = #tpu.dot_dimension_numbers<[1], [0], [0], [1], [0, 0, 1, 1], [], []>} : vector<2x128xbf16>, vector<128x64xbf16>, vector<2x64xf32> -> vector<2x64xf32>
    %120 = vector.broadcast %117 : vector<1x64xf32> to vector<2x64xf32>
    %121 = arith.addf %119, %120 : vector<2x64xf32>
    %cst_32 = arith.constant 0.000000e+00 : f32
    %122 = vector.broadcast %cst_32 : f32 to vector<2x64xf32>
    %123 = arith.maximumf %121, %122 : vector<2x64xf32>
    %c416 = arith.constant 416 : index
    %c0_33 = arith.constant 0 : index
    %124 = vector.load %arg3[%c416, %c0_33] : memref<528x256xbf16, #tpu.memory_space<vmem>>, vector<64x32xbf16>
    %c44 = arith.constant 44 : index
    %c0_34 = arith.constant 0 : index
    %125 = vector.load %arg1[%c44, %c0_34] : memref<56x512xf32, #tpu.memory_space<vmem>>, vector<1x32xf32>
    %126 = arith.truncf %123 : vector<2x64xf32> to vector<2x64xbf16>
    %cst_35 = arith.constant dense<0.000000e+00> : vector<2x32xf32>
    %127 = tpu.matmul %126, %124, %cst_35 {dimension_numbers = #tpu.dot_dimension_numbers<[1], [0], [0], [1], [0, 0, 1, 1], [], []>} : vector<2x64xbf16>, vector<64x32xbf16>, vector<2x32xf32> -> vector<2x32xf32>
    %128 = vector.broadcast %125 : vector<1x32xf32> to vector<2x32xf32>
    %129 = arith.addf %127, %128 : vector<2x32xf32>
    %cst_36 = arith.constant 0.000000e+00 : f32
    %130 = vector.broadcast %cst_36 : f32 to vector<2x32xf32>
    %131 = arith.maximumf %129, %130 : vector<2x32xf32>
    %c480 = arith.constant 480 : index
    %c0_37 = arith.constant 0 : index
    %132 = vector.load %arg3[%c480, %c0_37] : memref<528x256xbf16, #tpu.memory_space<vmem>>, vector<32x16xbf16>
    %c45 = arith.constant 45 : index
    %c0_38 = arith.constant 0 : index
    %133 = vector.load %arg1[%c45, %c0_38] : memref<56x512xf32, #tpu.memory_space<vmem>>, vector<1x16xf32>
    %134 = arith.truncf %131 : vector<2x32xf32> to vector<2x32xbf16>
    %cst_39 = arith.constant dense<0.000000e+00> : vector<2x16xf32>
    %135 = tpu.matmul %134, %132, %cst_39 {dimension_numbers = #tpu.dot_dimension_numbers<[1], [0], [0], [1], [0, 0, 1, 1], [], []>} : vector<2x32xbf16>, vector<32x16xbf16>, vector<2x16xf32> -> vector<2x16xf32>
    %136 = vector.broadcast %133 : vector<1x16xf32> to vector<2x16xf32>
    %137 = arith.addf %135, %136 : vector<2x16xf32>
    %cst_40 = arith.constant 0.000000e+00 : f32
    %138 = vector.broadcast %cst_40 : f32 to vector<2x16xf32>
    %139 = arith.maximumf %137, %138 : vector<2x16xf32>
    %c512 = arith.constant 512 : index
    %c0_41 = arith.constant 0 : index
    %140 = vector.load %arg3[%c512, %c0_41] : memref<528x256xbf16, #tpu.memory_space<vmem>>, vector<16x16xbf16>
    %c46 = arith.constant 46 : index
    %c0_42 = arith.constant 0 : index
    %141 = vector.load %arg1[%c46, %c0_42] : memref<56x512xf32, #tpu.memory_space<vmem>>, vector<1x16xf32>
    %142 = arith.truncf %139 : vector<2x16xf32> to vector<2x16xbf16>
    %cst_43 = arith.constant dense<0.000000e+00> : vector<2x16xf32>
    %143 = tpu.matmul %142, %140, %cst_43 {dimension_numbers = #tpu.dot_dimension_numbers<[1], [0], [0], [1], [0, 0, 1, 1], [], []>} : vector<2x16xbf16>, vector<16x16xbf16>, vector<2x16xf32> -> vector<2x16xf32>
    %144 = vector.broadcast %141 : vector<1x16xf32> to vector<2x16xf32>
    %145 = arith.addf %143, %144 : vector<2x16xf32>
    %c47 = arith.constant 47 : index
    %c0_44 = arith.constant 0 : index
    %146 = vector.load %arg1[%c47, %c0_44] : memref<56x512xf32, #tpu.memory_space<vmem>>, vector<1x512xf32>
    %c48 = arith.constant 48 : index
    %c0_45 = arith.constant 0 : index
    %147 = vector.load %arg1[%c48, %c0_45] : memref<56x512xf32, #tpu.memory_space<vmem>>, vector<1x512xf32>
    %148 = arith.truncf %99 : vector<2x32xf32> to vector<2x32xbf16>
    %c0_46 = arith.constant 0 : index
    %c0_47 = arith.constant 0 : index
    %149 = vector.load %arg4[%c0_46, %c0_47] : memref<32x512xbf16, #tpu.memory_space<vmem>>, vector<32x512xbf16>
    %cst_48 = arith.constant dense<0.000000e+00> : vector<2x512xf32>
    %150 = tpu.matmul %148, %149, %cst_48 {dimension_numbers = #tpu.dot_dimension_numbers<[1], [0], [0], [1], [0, 0, 1, 1], [], []>} : vector<2x32xbf16>, vector<32x512xbf16>, vector<2x512xf32> -> vector<2x512xf32>
    %151 = vector.broadcast %146 : vector<1x512xf32> to vector<2x512xf32>
    %152 = arith.addf %150, %151 : vector<2x512xf32>
    %cst_49 = arith.constant 0.000000e+00 : f32
    %153 = vector.broadcast %cst_49 : f32 to vector<2x512xf32>
    %154 = arith.maximumf %152, %153 : vector<2x512xf32>
    %155 = arith.truncf %154 : vector<2x512xf32> to vector<2x512xbf16>
    %c0_50 = arith.constant 0 : index
    %c0_51 = arith.constant 0 : index
    %156 = vector.load %arg5[%c0_50, %c0_51] : memref<512x512xbf16, #tpu.memory_space<vmem>>, vector<512x512xbf16>
    %cst_52 = arith.constant dense<0.000000e+00> : vector<2x512xf32>
    %157 = tpu.matmul %155, %156, %cst_52 {dimension_numbers = #tpu.dot_dimension_numbers<[1], [0], [0], [1], [0, 0, 1, 1], [], []>} : vector<2x512xbf16>, vector<512x512xbf16>, vector<2x512xf32> -> vector<2x512xf32>
    %158 = vector.broadcast %147 : vector<1x512xf32> to vector<2x512xf32>
    %159 = arith.addf %157, %158 : vector<2x512xf32>
    %c0_53 = arith.constant 0 : index
    %c0_54 = arith.constant 0 : index
    %160 = vector.load %arg7[%c0_53, %c0_54] : memref<2x512xf32, #tpu.memory_space<vmem>>, vector<2x512xf32>
    tpu.vector_store %arg7[%c0_53, %c0_54], %159 {strides = array<i32>} : memref<2x512xf32, #tpu.memory_space<vmem>>, vector<2x512xf32>,
    %cst_55 = arith.constant 0.000000e+00 : f32
    %161 = vector.broadcast %cst_55 : f32 to vector<2x80xf32>
    %162 = tpu.concatenate %18, %145, %161 in 1 : vector<2x32xf32>, vector<2x16xf32>, vector<2x80xf32> -> vector<2x128xf32>
    %c0_56 = arith.constant 0 : index
    %c0_57 = arith.constant 0 : index
    %163 = vector.load %arg6[%c0_56, %c0_57] : memref<2x128xf32, #tpu.memory_space<vmem>>, vector<2x128xf32>
    tpu.vector_store %arg6[%c0_56, %c0_57], %162 {strides = array<i32>} : memref<2x128xf32, #tpu.memory_space<vmem>>, vector<2x128xf32>,
    return
  }
}

</mosaic_0001>

<bundles_post_ra>
// kernel: forward.1
= control target key start
LH: loop header
LB: loop body
LE: loop exit
PB: predicated region body
PF: predicated region fallthrough
CT: control target
= control target key end

     0   :  { %13 = vsyncpa [#allocation3], 0  ;;  %s3916_s0 = inlined_call_operand.vmem [shape: f32[2,3,256], index: 0, kind: input, shape index: {}]   ;;  %s3917_s1 = inlined_call_operand.hbm [shape: f32[56,512], index: 1, kind: input, shape index: {}]   ;;  %s3918_s2 = inlined_call_operand.vmem [shape: f32[16], index: 2, kind: input, shape index: {}]   ;;  %s3919_s3 = inlined_call_operand.hbm [shape: bf16[528,256], index: 3, kind: input, shape index: {}]   ;;  %s3920_s4 = inlined_call_operand.vmem [shape: bf16[32,512], index: 4, kind: input, shape index: {}]   ;;  %s3921_s5 = inlined_call_operand.hbm [shape: bf16[512,512], index: 5, kind: input, shape index: {}]   ;;  %s3922_s6 = inlined_call_operand.vmem [shape: f32[2,128], index: 6, kind: output, shape index: {0}]   ;;  %s3923_s7 = inlined_call_operand.hbm [shape: f32[2,512], index: 7, kind: output, shape index: {1}]  }
   0x1   :  { %14 = vsyncpa [#allocation5], 0 }
   0x2   :  { %15 = vsyncpa [#allocation8], 0  ;;  %s45_s26 = sshll.u32 %s3919_s3, 4  ;;  %s46_s26 = int_to_ptr.hbm [resolvable:$true] %s45_s26 }
   0x3   :  { %16 = vsyncpa [#allocation4], 0  ;;  %s3338_s27 = smov [#allocation7]   ;;  %s23_s8 = sshll.u32 %s3917_s1, 4  ;;  %s24_s8 = int_to_ptr.hbm [resolvable:$true] %s23_s8 }
   0x4   :  { %s47_s28 = sshll.u32 %s3338_s27, 4  ;;  %s3339_s9 = smov 128   ;;  %s48_s28 = int_to_ptr.vmem [resolvable:$true] %s47_s28 }
   0x5   :  { %s3340_s10 = smov 8   ;;  %s3341_s11 = smov [#allocation2]  }
   0x6   :  { %53 = dma.hbm_to_vmem [thread:$0]  %s46_s26, 8448, %s48_s28, [#allocation8], %s3339_s9, %s3339_s9, %s3340_s10  }
   0x7   :  { %s25_s12 = sshll.u32 %s3341_s11, 4  ;;  %s3342_s13 = smov 512   ;;  %s26_s12 = int_to_ptr.vmem [resolvable:$true] %s25_s12 }
   0x8   :  { %s3343_s14 = smov 32   ;;  %s37_s16 = sshll.u32 %s3918_s2, 4  ;;  %s38_s16 = int_to_ptr.vmem [resolvable:$true] %s37_s16 }
   0x9   :  { %31 = dma.hbm_to_vmem [thread:$0]  %s24_s8, 3584, %s26_s12, [#allocation3], %s3342_s13, %s3342_s13, %s3343_s14  }
   0xa   :  { %s60_s1 = sshll.u32 %s3921_s5, 4  ;;  %s3344_s19 = smov [#allocation6]   ;;  %s61_s1 = int_to_ptr.hbm [resolvable:$true] %s60_s1 }
   0xb   :  { %40 = dma.vmem_to_smem %s38_s16, 16, %s3344_s19, [#allocation5]  }
   0xc   :  { %s3345_s20 = smov [#allocation9]   ;;  %s3346_s22 = smov 256  }
   0xd   :  { %s62_s21 = sshll.u32 %s3345_s20, 4  ;;  %s3347_s23 = smov 16   ;;  %s63_s21 = int_to_ptr.vmem [resolvable:$true] %s62_s21 }
   0xe   :  { %68 = dma.hbm_to_vmem [thread:$0]  %s61_s1, 16384, %s63_s21, [#allocation8], %s3346_s22, %s3346_s22, %s3347_s23  }
   0xf   :  { %3330 = dma.done.wait [#allocation3], 3584  }
  0x10   :  { %3331 = vsyncadd [#allocation3], 4294963712 }
  0x11   :  { %3332 = dma.done.wait [#allocation5], 16  }
  0x12   :  { %3333 = vsyncadd [#allocation5], 4294967280 }
  0x13   :  { %3334 = dma.done.wait [#allocation8], 24832  }
  0x14   :  { %3335 = vsyncadd [#allocation8], 4294942464 }
  0x15   :  { %85 = sfence }
  0x16   :  { %v88_v0 = vld [vmem:[%s3916_s0 + $0x8] sm:$0x77]  ;;  %v87_v1 = vld [vmem:[%s3916_s0] sm:$0x77]  ;;  %vm102_vm0 = vcmask 1042432   ;;  %v3348_v12 = vmov 256.0   ;;  %v177_v22 = vlaneseq }
  0x17   :  { %95 = vst [vmem:[#allocation1 + $0x10] ss:$2 sm:$0xff] %v88_v0  ;;  %3155 = vrcp.f32 %v3348_v12  ;;  %v146_v16 = vld [vmem:[#allocation2 + $0x80] sm:$0xff]  ;;  %vm126_vm2 = vcmask 256000   ;;  %vm151_vm3 = vcmask 1041409   ;;  %vm153_vm4 = vcmask 261120  }
  0x18   :  { %91 = vst [vmem:[#allocation1] ss:$2 sm:$0xff] %v87_v1  ;;  %168 = vmatpush.msra.mxu0 %v146_v16  ;;  %v145_v18 = vld [vmem:[#allocation2 + $0x60] sm:$0xff]  ;;  %v178_v24 = vshrl.u32 %v177_v22, 7  ;;  %s3422_s0 = sld [smem:[#allocation6 + $0x2]]  ;;  %vm684_vm5 = vcmask 130112  }
  0x19   :  { %v144_v19 = vld [vmem:[#allocation2 + $0x40] sm:$0xff]  ;;  %s244_s26 = sld [smem:[#allocation6]]  ;;  %vm688_vm6 = vcmask 195712   ;;  %vm692_vm7 = vcmask 261312   ;;  %vm1026_vm8 = vcmask 523264   ;;  %vm1089_vm9 = vcmask 130048  }
  0x1a   :  { %169 = vmatpush.msra.mxu0 %v145_v18  ;;  %v143_v20 = vld [vmem:[#allocation2 + $0x20] sm:$0xff]  ;;  %3149 = vset.pattern.permute.xlu2 %v178_v24  ;;  %v191_v28 = vadd.s32 16, %v178_v24  ;;  %v185_v57 = vadd.s32 8, %v178_v24  ;;  %v197_v58 = vadd.s32 24, %v178_v24  ;;  %s2260_s27 = sld [smem:[#allocation6 + $0x1]]  ;;  %vm2232_vm10 = vcmask 392192  }
  0x1b   :  { %v122_v25 = vld [vmem:[#allocation2] sm:$0x7]  ;;  %3147 = vset.pattern.permute.xlu1 %v178_v24  ;;  %v123_v44 = vld [vmem:[#allocation2 + $0x4] ss:$0 sm:$0xff]  ;;  %s2265_s28 = sld [smem:[#allocation6 + $0x6]]  ;;  %vm2219_vm11 = vcmask 1041408  }
  0x1c   :  { %170 = vmatpush.msra.mxu0 %v144_v19  ;;  %3151 = vset.pattern.permute.xlu0 %v191_v28  ;;  %v147_v52 = vld [vmem:[#allocation2 + $0xa0] ss:$0 sm:$0xff]  ;;  %s2266_s29 = sld [smem:[#allocation6 + $0x7]]  ;;  %vm2221_vm12 = vcmask 1045508   ;;  %s3349_s19 = smov [#allocation10]   ;;  %vm2223_vm13 = vcmask 1043456  }
  0x1d   :  { %v3156_v13 = vpop.eup %3155  ;;  %s2262_s30 = sld [smem:[#allocation6 + $0x3]]  ;;  %s2242_s20 = sshll.u32 %s3349_s19, 4  ;;  %s2243_s20 = int_to_ptr.vmem [resolvable:$true] %s2242_s20 }
  0x1e   :  { %v96_v2 = vld.sshfl [vmem:[#allocation1 + $0x10] sm:$0xff pattern:$0x75316420]  ;;  %v97_v3 = vld.sshfl [vmem:[#allocation1 + $0x18] sm:$0xff pattern:$0x75316420]  ;;  %vm118_vm1 = vweird.f32 %v3156_v13  ;;  %171 = vmatpush.msra.mxu0 %v143_v20  ;;  %v276_v61 = vstv %s3422_s0 }
  0x1f   :  { %v108_v4 = vsel %vm102_vm0, %v96_v2, 0.0  ;;  %v109_v5 = vsel %vm102_vm0, %v97_v3, 0.0  ;;  %v92_v7 = vld.sshfl [vmem:[#allocation1] sm:$0xff pattern:$0x75316420]  ;;  %v114_v14 = vmul.f32 256.0, %v3156_v13  ;;  %v3428_v62 = vstv %s244_s26 }
  0x20   :  { %v110_v6 = vadd.f32 %v109_v5, %v108_v4  ;;  %v93_v8 = vld.sshfl [vmem:[#allocation1 + $0x8] sm:$0xff pattern:$0x75316420]  ;;  %v103_v9 = vsel %vm102_vm0, %v92_v7, 0.0  ;;  %v3430_v63 = vstv %s2260_s27  ;;  %s3448_s8 = sld [smem:[#allocation6 + $0x8]]  ;;  %s2244_s22 = sshll.u32 %s3923_s7, 4  ;;  %s2245_s22 = int_to_ptr.hbm [resolvable:$true] %s2244_s22 }
  0x21   :  { %v104_v10 = vsel %vm102_vm0, %v93_v8, 0.0  ;;  %v115_v15 = vsub.f32 1.0, %v114_v14  ;;  %v3432_v0 = vstv %s2265_s28  ;;  %s2268_s9 = sld [smem:[#allocation6 + $0x9]] }
  0x22   :  { %111 = vadd.xlane.f32.xlu0 %v110_v6  ;;  %v105_v11 = vadd.f32 %v104_v10, %v103_v9  ;;  %v3434_v1 = vstv %s2266_s29  ;;  %s2263_s10 = sld [smem:[#allocation6 + $0x4]] }
  0x23   :  { %v116_v17 = vmul.f32 %v3156_v13, %v115_v15  ;;  %v3445_v12 = vstv %s2262_s30  ;;  %s2259_s11 = sld [smem:[#allocation6 + $0xc]] }
  0x24   :  { %s3725_s12 = sld [smem:[#allocation6 + $0xa]] }
  0x25   :  { %v117_v21 = vadd.f32 %v3156_v13, %v116_v17  ;;  %s2264_s13 = sld [smem:[#allocation6 + $0x5]] }
  0x26   :  { %v480_v17 = vstv %s3448_s8  ;;  %s3737_s3 = sld [smem:[#allocation6 + $0xb]] }
  0x27   :  { %v119_v23 = vsel %vm118_vm1, %v3156_v13, %v117_v21 }
  0x2a   :  { %106 = vadd.xlane.f32.xlu0 %v105_v11 }
  0x95   :  { %v112_v26 = vpop.xlane.xlu0 %111 }
  0x96   :  { %v121_v27 = vmul.f32 %v119_v23, %v112_v26  ;;  %v3464_v26 = vstv %s2268_s9 }
  0x98   :  { %v125_v29 = vmul.f32 %v122_v25, %v121_v27 }
  0x9a   :  { %v134_v30 = vsel %vm126_vm2, %v125_v29, 0.0 }
  0x9b   :  { %v135_v31 = vrot.slane %v134_v30, 4 }
  0x9d   :  { %v136_v32 = vadd.f32 %v135_v31, %v134_v30  ;;  %v107_v33 = vpop.xlane.xlu0 %106 }
  0x9e   :  { %v120_v34 = vmul.f32 %v119_v23, %v107_v33 }
  0x9f   :  { %v137_v35 = vrot.slane %v136_v32, 2 }
  0xa0   :  { %v124_v36 = vmul.f32 %v122_v25, %v120_v34 }
  0xa1   :  { %v138_v37 = vadd.f32 %v137_v35, %v136_v32 }
  0xa2   :  { %v127_v38 = vsel %vm126_vm2, %v124_v36, 0.0 }
  0xa3   :  { %v139_v39 = vrot.slane %v138_v37, 1  ;;  %v128_v40 = vrot.slane %v127_v38, 4 }
  0xa5   :  { %v129_v41 = vadd.f32 %v128_v40, %v127_v38  ;;  %v140_v43 = vadd.f32 %v139_v39, %v138_v37 }
  0xa7   :  { %v130_v42 = vrot.slane %v129_v41, 2  ;;  %v142_v47 = vadd.f32 %v140_v43, %v123_v44 }
  0xa9   :  { %v131_v45 = vadd.f32 %v130_v42, %v129_v41  ;;  %v150_v50 = vrot.slane %v142_v47, 7 }
  0xab   :  { %v132_v46 = vrot.slane %v131_v45, 1 }
  0xad   :  { %v133_v48 = vadd.f32 %v132_v46, %v131_v45 }
  0xaf   :  { %v141_v49 = vadd.f32 %v133_v48, %v123_v44 }
  0xb1   :  { %v152_v51 = vsel %vm151_vm3, %v150_v50, %v141_v49 }
  0xb2   :  { %2258 = vmatmul.msk.f32.vlgmr.msra.gmra.mxu0 %vm153_vm4, %v152_v51 }
 0x12f   :  { %v173_v53 = vpop.f32.mrf.mxu0 }
 0x130   :  { %v3412_v54 = vadd.f32 %v173_v53, %v147_v52 }
 0x132   :  { %v3415_v55 = vperm.slane %v3412_v54, 0  ;;  %v201_v56 = vperm.slane %v3412_v54, 1  ;;  %v227_v59 = vrot.slane %v3412_v54, 1  ;;  %v277_v30 = vmul.f32 %v276_v61, %v3412_v54 }
 0x134   :  { %206 = vperm.xlu2 %3149, %v201_v56   ;;  %193 = vperm.xlu0 %3151, %v3415_v55   ;;  %v3425_v60 = vperm.slane %v227_v59, 0  ;;  %v278_v4 = vmul.f32 %v276_v61, %v227_v59  ;;  %v482_v19 = vmul.f32 %v480_v17, %v227_v59  ;;  %v281_v38 = vperm.slane %v277_v30, 0 }
 0x135   :  { %181 = vperm.xlu1 %3147, %v3415_v55  }
 0x136   :  { %v3443_v11 = vperm.slane %v278_v4, 0  ;;  %v3461_v24 = vperm.slane %v482_v19, 0 }
 0x13c   :  { %3150 = vset.pattern.permute.xlu2 %v185_v57  ;;  %3154 = vset.pattern.permute.xlu0 %v197_v58 }
 0x13d   :  { %3148 = vset.pattern.permute.xlu1 %v185_v57 }
 0x144   :  { %212 = vperm.xlu2 %3150, %v201_v56  }
 0x145   :  { %187 = vperm.xlu1 %3148, %v3415_v55  }
 0x14c   :  { %3153 = vset.pattern.permute.xlu2 %v191_v28 }
 0x14d   :  { %3152 = vset.pattern.permute.xlu1 %v197_v58 }
 0x154   :  { %218 = vperm.xlu2 %3153, %v201_v56  }
 0x155   :  { %199 = vperm.xlu1 %3152, %v3415_v55  }
 0x15d   :  { %224 = vperm.xlu1 %3152, %v201_v56  }
 0x18e   :  { %v207_v2 = vpop.permute.xlu2 %206 }
 0x18f   :  { %v237_v3 = vmul.f32 %v3425_v60, %v207_v2  ;;  %v264_v6 = vmul.f32 %v3430_v63, %v207_v2  ;;  %v468_v8 = vmul.f32 %v3434_v1, %v207_v2 }
 0x191   :  { %v255_v5 = vmul.f32 %v3428_v62, %v237_v3  ;;  %v459_v7 = vmul.f32 %v3432_v0, %v237_v3 }
 0x193   :  { %v272_v9 = vadd.f32 %v264_v6, %v255_v5  ;;  %v3441_v10 = vadd.f32 %v468_v8, %v459_v7 }
 0x195   :  { %v289_v13 = vadd.f32 %v3443_v11, %v272_v9 }
 0x197   :  { %v3451_v14 = vadd.f32 %v3445_v12, %v289_v13 }
 0x199   :  { %v314_v15 = vsel %vm153_vm4, %v3451_v14, -inf }
 0x19a   :  { %315 = vmax.xlane.f32.xlu0 %v314_v15 }
 0x19e   :  { %v213_v16 = vpop.permute.xlu2 %212 }
 0x19f   :  { %v238_v18 = vmul.f32 %v3425_v60, %v213_v16  ;;  %v469_v21 = vmul.f32 %v3434_v1, %v213_v16  ;;  %v265_v35 = vmul.f32 %v3430_v63, %v213_v16 }
 0x1a1   :  { %v460_v20 = vmul.f32 %v3432_v0, %v238_v18  ;;  %v256_v31 = vmul.f32 %v3428_v62, %v238_v18 }
 0x1a3   :  { %v477_v23 = vadd.f32 %v469_v21, %v460_v20  ;;  %v273_v39 = vadd.f32 %v265_v35, %v256_v31 }
 0x1a5   :  { %v494_v25 = vadd.f32 %v3461_v24, %v477_v23  ;;  %v290_v47 = vadd.f32 %v3443_v11, %v273_v39 }
 0x1a6   :  { %v3477_v36 = vpop.permute.xlu0 %193 }
 0x1a7   :  { %v182_v27 = vpop.permute.xlu1 %181  ;;  %v3467_v28 = vadd.f32 %v3464_v26, %v494_v25  ;;  %v3481_v40 = vmul.f32 %v3477_v36, %v3415_v55  ;;  %v262_v51 = vmul.f32 %v3430_v63, %v3477_v36  ;;  %v3498_v53 = vadd.f32 %v3445_v12, %v290_v47 }
 0x1a8   :  { %v233_v29 = vmul.f32 %v182_v27, %v3415_v55  ;;  %v260_v34 = vmul.f32 %v3430_v63, %v182_v27  ;;  %v464_v23 = vmul.f32 %v3434_v1, %v182_v27  ;;  %v481_v25 = vmul.f32 %v480_v17, %v3412_v54 }
 0x1a9   :  { %v521_v32 = vsel %vm153_vm4, %v3467_v28, -inf  ;;  %v253_v48 = vmul.f32 %v3428_v62, %v3481_v40  ;;  %v317_v2 = vsel %vm153_vm4, %v3498_v53, -inf }
 0x1aa   :  { %v251_v33 = vmul.f32 %v3428_v62, %v233_v29  ;;  %522 = vmax.xlane.f32.xlu0 %v521_v32  ;;  %v455_v18 = vmul.f32 %v3432_v0, %v233_v29  ;;  %v485_v32 = vperm.slane %v481_v25, 0 }
 0x1ab   :  { %v270_v56 = vadd.f32 %v262_v51, %v253_v48  ;;  %v493_v48 = vadd.f32 %v3461_v24, %v3441_v10 }
 0x1ac   :  { %v268_v37 = vadd.f32 %v260_v34, %v251_v33  ;;  %v472_v30 = vadd.f32 %v464_v23, %v455_v18 }
 0x1ad   :  { %v287_v6 = vadd.f32 %v281_v38, %v270_v56 }
 0x1ae   :  { %v219_v41 = vpop.permute.xlu2 %218  ;;  %v285_v42 = vadd.f32 %v281_v38, %v268_v37  ;;  %v489_v34 = vadd.f32 %v485_v32, %v472_v30 }
 0x1af   :  { %v239_v43 = vmul.f32 %v3425_v60, %v219_v41  ;;  %v470_v46 = vmul.f32 %v3434_v1, %v219_v41  ;;  %v266_v7 = vmul.f32 %v3430_v63, %v219_v41  ;;  %v3513_v13 = vadd.f32 %v3445_v12, %v287_v6 }
 0x1b0   :  { %v3485_v44 = vadd.f32 %v3445_v12, %v285_v42  ;;  %v3537_v17 = vadd.f32 %v3464_v26, %v489_v34 }
 0x1b1   :  { %v461_v45 = vmul.f32 %v3432_v0, %v239_v43  ;;  %v257_v3 = vmul.f32 %v3428_v62, %v239_v43  ;;  %v308_v19 = vsel %vm153_vm4, %v3513_v13, -inf }
 0x1b2   :  { %v302_v49 = vsel %vm153_vm4, %v3485_v44, -inf  ;;  %v506_v47 = vsel %vm153_vm4, %v3537_v17, -inf }
 0x1b3   :  { %v478_v50 = vadd.f32 %v470_v46, %v461_v45  ;;  %303 = vmax.xlane.f32.xlu2 %v302_v49  ;;  %v274_v9 = vadd.f32 %v266_v7, %v257_v3  ;;  %v466_v7 = vmul.f32 %v3434_v1, %v3477_v36 }
 0x1b5   :  { %v495_v52 = vadd.f32 %v3461_v24, %v478_v50  ;;  %v291_v21 = vadd.f32 %v3443_v11, %v274_v9 }
 0x1b7   :  { %v188_v57 = vpop.permute.xlu1 %187  ;;  %v3501_v58 = vadd.f32 %v3464_v26, %v495_v52  ;;  %v3529_v31 = vadd.f32 %v3445_v12, %v291_v21 }
 0x1b8   :  { %v234_v59 = vmul.f32 %v188_v57, %v3415_v55  ;;  %v261_v5 = vmul.f32 %v3430_v63, %v188_v57  ;;  %v465_v52 = vmul.f32 %v3434_v1, %v188_v57 }
 0x1b9   :  { %v524_v61 = vsel %vm153_vm4, %v3501_v58, -inf  ;;  %v320_v27 = vsel %vm153_vm4, %v3529_v31, -inf }
 0x1ba   :  { %v252_v4 = vmul.f32 %v3428_v62, %v234_v59  ;;  %525 = vmax.xlane.f32.xlu0 %v524_v61  ;;  %v456_v46 = vmul.f32 %v3432_v0, %v234_v59  ;;  %v3556_v61 = vadd.f32 %v3464_v26, %v493_v48 }
 0x1bb   :  { %318 = vmax.xlane.f32.xlu2 %v317_v2 }
 0x1bc   :  { %v269_v8 = vadd.f32 %v261_v5, %v252_v4  ;;  %v473_v10 = vadd.f32 %v465_v52, %v456_v46  ;;  %v457_v4 = vmul.f32 %v3432_v0, %v3481_v40 }
 0x1be   :  { %v286_v15 = vadd.f32 %v281_v38, %v269_v8  ;;  %v490_v6 = vadd.f32 %v485_v32, %v473_v10 }
 0x1c0   :  { %v3516_v16 = vadd.f32 %v3445_v12, %v286_v15  ;;  %v3574_v8 = vadd.f32 %v3464_v26, %v490_v6 }
 0x1c2   :  { %v305_v20 = vsel %vm153_vm4, %v3516_v16, -inf  ;;  %v509_v15 = vsel %vm153_vm4, %v3574_v8, -inf }
 0x1c3   :  { %309 = vmax.xlane.f32.xlu2 %v308_v19  ;;  %306 = vmax.xlane.f32.xlu1 %v305_v20 }
 0x1c7   :  { %v200_v29 = vpop.permute.xlu1 %199 }
 0x1c8   :  { %v236_v33 = vmul.f32 %v200_v29, %v3415_v55  ;;  %v263_v37 = vmul.f32 %v3430_v63, %v200_v29  ;;  %v467_v56 = vmul.f32 %v3434_v1, %v200_v29 }
 0x1ca   :  { %v254_v35 = vmul.f32 %v3428_v62, %v236_v33  ;;  %v458_v49 = vmul.f32 %v3432_v0, %v236_v33 }
 0x1cb   :  { %321 = vmax.xlane.f32.xlu2 %v320_v27 }
 0x1cc   :  { %v271_v39 = vadd.f32 %v263_v37, %v254_v35  ;;  %v475_v2 = vadd.f32 %v467_v56, %v458_v49 }
 0x1ce   :  { %v288_v41 = vadd.f32 %v281_v38, %v271_v39  ;;  %v492_v5 = vadd.f32 %v485_v32, %v475_v2 }
 0x1cf   :  { %v225_v42 = vpop.permute.xlu1 %224 }
 0x1d0   :  { %v240_v43 = vmul.f32 %v3425_v60, %v225_v42  ;;  %v3541_v45 = vadd.f32 %v3445_v12, %v288_v41  ;;  %v267_v38 = vmul.f32 %v3430_v63, %v225_v42  ;;  %v518_v63 = vsel %vm153_vm4, %v3556_v61, -inf }
 0x1d1   :  { %v471_v36 = vmul.f32 %v3434_v1, %v225_v42 }
 0x1d2   :  { %v258_v50 = vmul.f32 %v3428_v62, %v240_v43  ;;  %v311_v51 = vsel %vm153_vm4, %v3541_v45, -inf  ;;  %v462_v9 = vmul.f32 %v3432_v0, %v240_v43 }
 0x1d3   :  { %507 = vmax.xlane.f32.xlu2 %v506_v47  ;;  %312 = vmax.xlane.f32.xlu1 %v311_v51 }
 0x1d4   :  { %v275_v59 = vadd.f32 %v267_v38, %v258_v50  ;;  %v479_v19 = vadd.f32 %v471_v36, %v462_v9 }
 0x1d6   :  { %v292_v3 = vadd.f32 %v3443_v11, %v275_v59  ;;  %v474_v11 = vadd.f32 %v466_v7, %v457_v4  ;;  %v496_v0 = vadd.f32 %v3461_v24, %v479_v19 }
 0x1d8   :  { %v3560_v62 = vadd.f32 %v3445_v12, %v292_v3  ;;  %v3571_v12 = vadd.f32 %v3464_v26, %v492_v5  ;;  %v491_v18 = vadd.f32 %v485_v32, %v474_v11  ;;  %v3589_v23 = vadd.f32 %v3464_v26, %v496_v0 }
 0x1da   :  { %v323_v57 = vsel %vm153_vm4, %v3560_v62, -inf  ;;  %v515_v40 = vsel %vm153_vm4, %v3571_v12, -inf  ;;  %v3583_v20 = vadd.f32 %v3464_v26, %v491_v18  ;;  %v527_v25 = vsel %vm153_vm4, %v3589_v23, -inf }
 0x1db   :  { %519 = vmax.xlane.f32.xlu2 %v518_v63  ;;  %324 = vmax.xlane.f32.xlu1 %v323_v57 }
 0x1dc   :  { %v512_v21 = vsel %vm153_vm4, %v3583_v20, -inf }
 0x1e3   :  { %516 = vmax.xlane.f32.xlu2 %v515_v40  ;;  %510 = vmax.xlane.f32.xlu1 %v509_v15 }
 0x1eb   :  { %513 = vmax.xlane.f32.xlu1 %v512_v21 }
 0x1f3   :  { %528 = vmax.xlane.f32.xlu1 %v527_v25 }
 0x20d   :  { %v316_v30 = vpop.xlane.xlu0 %315 }
 0x20e   :  { %v330_v1 = vsub.f32 %v3451_v14, %v316_v30 }
 0x210   :  { %v342_v29 = vmul.f32 1.442695, %v330_v1 }
 0x212   :  { %3157 = vpow2.f32 %v342_v29 }
 0x218   :  { %v3594_v32 = vpop.eup %3157 }
 0x219   :  { %v362_v33 = vsel %vm153_vm4, %v3594_v32, 0.0 }
 0x21a   :  { %363 = vadd.xlane.f32.xlu1 %v362_v33 }
 0x21d   :  { %v523_v4 = vpop.xlane.xlu0 %522 }
 0x21e   :  { %v535_v7 = vsub.f32 %v3467_v28, %v523_v4 }
 0x220   :  { %v548_v15 = vmul.f32 1.442695, %v535_v7 }
 0x226   :  { %v304_v24 = vpop.xlane.xlu2 %303 }
 0x227   :  { %v326_v34 = vsub.f32 %v3485_v44, %v304_v24 }
 0x229   :  { %v334_v26 = vmul.f32 1.442695, %v326_v34 }
 0x22b   :  { %3159 = vpow2.f32 %v334_v26 }
 0x22d   :  { %v526_v18 = vpop.xlane.xlu0 %525 }
 0x22e   :  { %v319_v35 = vpop.xlane.xlu2 %318  ;;  %v536_v28 = vsub.f32 %v3501_v58, %v526_v18 }
 0x22f   :  { %v331_v37 = vsub.f32 %v3498_v53, %v319_v35 }
 0x231   :  { %v3600_v27 = vpop.eup %3159  ;;  %v344_v39 = vmul.f32 1.442695, %v331_v37 }
 0x232   :  { %v350_v14 = vsel %vm153_vm4, %v3600_v27, 0.0 }
 0x233   :  { %3161 = vpow2.f32 %v344_v39  ;;  %351 = vadd.xlane.f32.xlu2 %v350_v14 }
 0x236   :  { %v310_v41 = vpop.xlane.xlu2 %309  ;;  %v307_v42 = vpop.xlane.xlu1 %306 }
 0x237   :  { %v327_v43 = vsub.f32 %v3516_v16, %v307_v42  ;;  %v328_v47 = vsub.f32 %v3513_v13, %v310_v41 }
 0x239   :  { %v3605_v46 = vpop.eup %3161  ;;  %v336_v44 = vmul.f32 1.442695, %v327_v43  ;;  %v338_v48 = vmul.f32 1.442695, %v328_v47 }
 0x23a   :  { %v365_v53 = vsel %vm153_vm4, %v3605_v46, 0.0 }
 0x23b   :  { %366 = vadd.xlane.f32.xlu2 %v365_v53  ;;  %3163 = vpow2.f32 %v336_v44 }
 0x23c   :  { %3165 = vpow2.f32 %v338_v48 }
 0x23e   :  { %v322_v49 = vpop.xlane.xlu2 %321 }
 0x23f   :  { %v332_v50 = vsub.f32 %v3529_v31, %v322_v49 }
 0x241   :  { %v346_v38 = vmul.f32 1.442695, %v332_v50  ;;  %v3611_v51 = vpop.eup %3163 }
 0x242   :  { %v353_v16 = vsel %vm153_vm4, %v3611_v51, 0.0  ;;  %v3616_v59 = vpop.eup %3165 }
 0x243   :  { %3167 = vpow2.f32 %v346_v38  ;;  %354 = vadd.xlane.f32.xlu0 %v353_v16  ;;  %v356_v63 = vsel %vm153_vm4, %v3616_v59, 0.0 }
 0x246   :  { %v508_v52 = vpop.xlane.xlu2 %507  ;;  %v313_v13 = vpop.xlane.xlu1 %312 }
 0x247   :  { %v329_v56 = vsub.f32 %v3541_v45, %v313_v13  ;;  %v530_v31 = vsub.f32 %v3537_v17, %v508_v52 }
 0x249   :  { %v3618_v10 = vpop.eup %3167  ;;  %v340_v2 = vmul.f32 1.442695, %v329_v56  ;;  %v538_v57 = vmul.f32 1.442695, %v530_v31 }
 0x24a   :  { %v368_v3 = vsel %vm153_vm4, %v3618_v10, 0.0 }
 0x24b   :  { %369 = vadd.xlane.f32.xlu2 %v368_v3  ;;  %3169 = vpow2.f32 %v340_v2  ;;  %357 = vadd.xlane.f32.xlu0 %v356_v63 }
 0x24c   :  { %3171 = vpow2.f32 %v538_v57 }
 0x24e   :  { %v520_v5 = vpop.xlane.xlu2 %519  ;;  %v325_v45 = vpop.xlane.xlu1 %324 }
 0x24f   :  { %v333_v6 = vsub.f32 %v3560_v62, %v325_v45  ;;  %v534_v17 = vsub.f32 %v3556_v61, %v520_v5 }
 0x251   :  { %v348_v11 = vmul.f32 1.442695, %v333_v6  ;;  %v3627_v9 = vpop.eup %3169  ;;  %v546_v36 = vmul.f32 1.442695, %v534_v17 }
 0x252   :  { %v359_v40 = vsel %vm153_vm4, %v3627_v9, 0.0  ;;  %v3633_v0 = vpop.eup %3171 }
 0x253   :  { %3173 = vpow2.f32 %v348_v11  ;;  %360 = vadd.xlane.f32.xlu1 %v359_v40  ;;  %v554_v1 = vsel %vm153_vm4, %v3633_v0, 0.0 }
 0x254   :  { %3175 = vpow2.f32 %v548_v15 }
 0x255   :  { %3177 = vpow2.f32 %v546_v36 }
 0x256   :  { %v511_v19 = vpop.xlane.xlu1 %510  ;;  %v517_v21 = vpop.xlane.xlu2 %516 }
 0x257   :  { %v531_v62 = vsub.f32 %v3574_v8, %v511_v19  ;;  %v533_v61 = vsub.f32 %v3571_v12, %v517_v21  ;;  %v550_v8 = vmul.f32 1.442695, %v536_v28 }
 0x259   :  { %v540_v25 = vmul.f32 1.442695, %v531_v62  ;;  %v3636_v30 = vpop.eup %3173  ;;  %v544_v33 = vmul.f32 1.442695, %v533_v61 }
 0x25a   :  { %v371_v29 = vsel %vm153_vm4, %v3636_v30, 0.0  ;;  %v3643_v34 = vpop.eup %3175 }
 0x25b   :  { %3179 = vpow2.f32 %v540_v25  ;;  %555 = vadd.xlane.f32.xlu1 %v554_v1  ;;  %372 = vadd.xlane.f32.xlu0 %v371_v29  ;;  %v3646_v26 = vpop.eup %3177  ;;  %v569_v37 = vsel %vm153_vm4, %v3643_v34, 0.0 }
 0x25c   :  { %3181 = vpow2.f32 %v550_v8  ;;  %v566_v39 = vsel %vm153_vm4, %v3646_v26, 0.0 }
 0x25d   :  { %3183 = vpow2.f32 %v544_v33 }
 0x25e   :  { %v514_v24 = vpop.xlane.xlu1 %513 }
 0x25f   :  { %v532_v58 = vsub.f32 %v3583_v20, %v514_v24 }
 0x261   :  { %v542_v12 = vmul.f32 1.442695, %v532_v58  ;;  %v3648_v35 = vpop.eup %3179 }
 0x262   :  { %v557_v14 = vsel %vm153_vm4, %v3648_v35, 0.0  ;;  %v3656_v41 = vpop.eup %3181 }
 0x263   :  { %3185 = vpow2.f32 %v542_v12  ;;  %570 = vadd.xlane.f32.xlu1 %v569_v37  ;;  %567 = vadd.xlane.f32.xlu0 %v566_v39  ;;  %v3659_v43 = vpop.eup %3183  ;;  %v572_v48 = vsel %vm153_vm4, %v3656_v41, 0.0 }
 0x264   :  { %558 = vadd.xlane.f32.xlu2 %v557_v14  ;;  %v563_v49 = vsel %vm153_vm4, %v3659_v43, 0.0 }
 0x266   :  { %v529_v20 = vpop.xlane.xlu1 %528 }
 0x267   :  { %v537_v42 = vsub.f32 %v3589_v23, %v529_v20 }
 0x269   :  { %v3661_v44 = vpop.eup %3185  ;;  %v552_v47 = vmul.f32 1.442695, %v537_v42 }
 0x26a   :  { %v560_v53 = vsel %vm153_vm4, %v3661_v44, 0.0 }
 0x26b   :  { %3187 = vpow2.f32 %v552_v47  ;;  %573 = vadd.xlane.f32.xlu1 %v572_v48  ;;  %564 = vadd.xlane.f32.xlu0 %v563_v49 }
 0x26c   :  { %561 = vadd.xlane.f32.xlu2 %v560_v53 }
 0x271   :  { %v3669_v50 = vpop.eup %3187 }
 0x272   :  { %v575_v23 = vsel %vm153_vm4, %v3669_v50, 0.0 }
 0x274   :  { %576 = vadd.xlane.f32.xlu2 %v575_v23 }
 0x28d   :  { %v364_v38 = vpop.xlane.xlu1 %363 }
 0x28e   :  { %3189 = vrcp.f32 %v364_v38 }
 0x294   :  { %v3190_v16 = vpop.eup %3189 }
 0x295   :  { %v386_v52 = vmul.f32 %v3190_v16, %v3594_v32 }
 0x297   :  { %v394_v13 = vmul.f32 %v386_v52, %v3425_v60 }
 0x299   :  { %v410_v56 = vsel %vm153_vm4, %v394_v13, 0.0 }
 0x29a   :  { %411 = vadd.xlane.f32.xlu2 %v410_v56 }
 0x2a6   :  { %v352_v2 = vpop.xlane.xlu2 %351 }
 0x2a7   :  { %3191 = vrcp.f32 %v352_v2 }
 0x2ad   :  { %v3192_v31 = vpop.eup %3191 }
 0x2ae   :  { %v367_v3 = vpop.xlane.xlu2 %366  ;;  %v382_v63 = vmul.f32 %v3192_v31, %v3600_v27 }
 0x2af   :  { %3193 = vrcp.f32 %v367_v3 }
 0x2b0   :  { %v390_v4 = vmul.f32 %v382_v63, %v3415_v55 }
 0x2b2   :  { %v398_v57 = vsel %vm153_vm4, %v390_v4, 0.0 }
 0x2b3   :  { %399 = vadd.xlane.f32.xlu0 %v398_v57 }
 0x2b5   :  { %v3194_v5 = vpop.eup %3193 }
 0x2b6   :  { %v387_v32 = vmul.f32 %v3194_v5, %v3605_v46  ;;  %v355_v45 = vpop.xlane.xlu0 %354 }
 0x2b7   :  { %3195 = vrcp.f32 %v355_v45 }
 0x2b8   :  { %v395_v6 = vmul.f32 %v387_v32, %v3425_v60 }
 0x2ba   :  { %v413_v7 = vsel %vm153_vm4, %v395_v6, 0.0 }
 0x2bb   :  { %414 = vadd.xlane.f32.xlu0 %v413_v7 }
 0x2bd   :  { %v3196_v11 = vpop.eup %3195 }
 0x2be   :  { %v370_v17 = vpop.xlane.xlu2 %369  ;;  %v358_v27 = vpop.xlane.xlu0 %357  ;;  %v383_v40 = vmul.f32 %v3196_v11, %v3611_v51 }
 0x2bf   :  { %3197 = vrcp.f32 %v370_v17 }
 0x2c0   :  { %3199 = vrcp.f32 %v358_v27  ;;  %v391_v15 = vmul.f32 %v383_v40, %v3415_v55 }
 0x2c2   :  { %v401_v18 = vsel %vm153_vm4, %v391_v15, 0.0 }
 0x2c3   :  { %402 = vadd.xlane.f32.xlu1 %v401_v18 }
 0x2c5   :  { %v3198_v46 = vpop.eup %3197 }
 0x2c6   :  { %v3200_v36 = vpop.eup %3199  ;;  %v388_v19 = vmul.f32 %v3198_v46, %v3618_v10  ;;  %v361_v21 = vpop.xlane.xlu1 %360 }
 0x2c7   :  { %v384_v62 = vmul.f32 %v3200_v36, %v3616_v59  ;;  %3201 = vrcp.f32 %v361_v21 }
 0x2c8   :  { %v396_v28 = vmul.f32 %v388_v19, %v3425_v60 }
 0x2c9   :  { %v392_v25 = vmul.f32 %v384_v62, %v3415_v55 }
 0x2ca   :  { %v416_v51 = vsel %vm153_vm4, %v396_v28, 0.0 }
 0x2cb   :  { %v404_v61 = vsel %vm153_vm4, %v392_v25, 0.0  ;;  %417 = vadd.xlane.f32.xlu0 %v416_v51  ;;  %v2281_v25 = vld [vmem:[#allocation7 + $0x10] sm:$0xf]  ;;  %v2966_v51 = vld [vmem:[#allocation7 + $0x14] sm:$0xf] }
 0x2cc   :  { %405 = vadd.xlane.f32.xlu1 %v404_v61  ;;  %v3727_v61 = vstv %s2263_s10 }
 0x2cd   :  { %v3202_v1 = vpop.eup %3201 }
 0x2ce   :  { %v373_v29 = vpop.xlane.xlu0 %372  ;;  %v556_v8 = vpop.xlane.xlu1 %555  ;;  %v385_v33 = vmul.f32 %v3202_v1, %v3627_v9 }
 0x2cf   :  { %3203 = vrcp.f32 %v373_v29  ;;  %v2283_v29 = vld [vmem:[#allocation7 + $0x18] sm:$0xf0] }
 0x2d0   :  { %3205 = vrcp.f32 %v556_v8  ;;  %v393_v59 = vmul.f32 %v385_v33, %v3415_v55  ;;  %v2286_v33 = vor.u32 %v2966_v51, %v2283_v29 }
 0x2d2   :  { %v407_v10 = vsel %vm153_vm4, %v393_v59, 0.0  ;;  %745 = vmatpush.bf16.msra.mxu2 %v2286_v33 }
 0x2d3   :  { %408 = vadd.xlane.f32.xlu2 %v407_v10  ;;  %v2273_v10 = vld [vmem:[#allocation7] sm:$0xf] }
 0x2d5   :  { %v3204_v24 = vpop.eup %3203 }
 0x2d6   :  { %v3206_v58 = vpop.eup %3205  ;;  %v568_v12 = vpop.xlane.xlu0 %567  ;;  %v389_v39 = vmul.f32 %v3204_v24, %v3636_v30  ;;  %v2965_v24 = vld [vmem:[#allocation7 + $0x4] sm:$0xf0] }
 0x2d7   :  { %v571_v37 = vpop.xlane.xlu1 %570  ;;  %3207 = vrcp.f32 %v568_v12  ;;  %v559_v14 = vpop.xlane.xlu2 %558  ;;  %v586_v20 = vmul.f32 %v3206_v58, %v3633_v0  ;;  %v2964_v58 = vld [vmem:[#allocation7 + $0x4] sm:$0xf]  ;;  %v3731_v12 = vstv %s2259_s11 }
 0x2d8   :  { %3209 = vrcp.f32 %v559_v14  ;;  %v397_v9 = vmul.f32 %v389_v39, %v3425_v60  ;;  %v2274_v14 = vor.u32 %v2965_v24, %v2273_v10 }
 0x2d9   :  { %3211 = vrcp.f32 %v571_v37  ;;  %v594_v42 = vmul.f32 %v586_v20, %v3415_v55  ;;  %v2275_v20 = vld [vmem:[#allocation7 + $0x8] sm:$0xf0] }
 0x2da   :  { %v419_v47 = vsel %vm153_vm4, %v397_v9, 0.0 }
 0x2db   :  { %420 = vadd.xlane.f32.xlu1 %v419_v47  ;;  %v602_v53 = vsel %vm153_vm4, %v594_v42, 0.0 }
 0x2dc   :  { %603 = vadd.xlane.f32.xlu2 %v602_v53  ;;  %v2278_v53 = vor.u32 %v2964_v58, %v2275_v20 }
 0x2dd   :  { %v3208_v48 = vpop.eup %3207 }
 0x2de   :  { %v3210_v49 = vpop.eup %3209  ;;  %v565_v23 = vpop.xlane.xlu0 %564  ;;  %v590_v38 = vmul.f32 %v3208_v48, %v3646_v26  ;;  %746 = vmatpush.bf16.msra.mxu2 %v2278_v53 }
 0x2df   :  { %v574_v30 = vpop.xlane.xlu1 %573  ;;  %v3212_v16 = vpop.eup %3211  ;;  %3213 = vrcp.f32 %v565_v23  ;;  %v587_v52 = vmul.f32 %v3210_v49, %v3648_v35 }
 0x2e0   :  { %v562_v0 = vpop.xlane.xlu2 %561  ;;  %v598_v13 = vmul.f32 %v590_v38, %v3425_v60  ;;  %v591_v56 = vmul.f32 %v3212_v16, %v3643_v34 }
 0x2e1   :  { %3215 = vrcp.f32 %v562_v0  ;;  %v595_v2 = vmul.f32 %v587_v52, %v3415_v55  ;;  %v3746_v52 = vstv %s2264_s13 }
 0x2e2   :  { %3217 = vrcp.f32 %v574_v30  ;;  %v614_v31 = vsel %vm153_vm4, %v598_v13, 0.0  ;;  %v599_v3 = vmul.f32 %v591_v56, %v3425_v60  ;;  %v3742_v30 = vstv %s3725_s12  ;;  %v2319_v56 = vld [vmem:[#allocation7 + $0x90] sm:$0xf] }
 0x2e3   :  { %615 = vadd.xlane.f32.xlu1 %v614_v31  ;;  %v605_v26 = vsel %vm153_vm4, %v595_v2, 0.0  ;;  %v2975_v2 = vld [vmem:[#allocation7 + $0x94] sm:$0xf0]  ;;  %v2315_v31 = vld [vmem:[#allocation7 + $0x80] sm:$0xf] }
 0x2e4   :  { %606 = vadd.xlane.f32.xlu0 %v605_v26  ;;  %v617_v63 = vsel %vm153_vm4, %v599_v3, 0.0 }
 0x2e5   :  { %v3214_v4 = vpop.eup %3213  ;;  %618 = vadd.xlane.f32.xlu2 %v617_v63  ;;  %v2320_v63 = vor.u32 %v2975_v2, %v2319_v56  ;;  %v2303_v56 = vld [vmem:[#allocation7 + $0x50] sm:$0xf]  ;;  %v2971_v2 = vld [vmem:[#allocation7 + $0x54] sm:$0xf0] }
 0x2e6   :  { %v589_v57 = vmul.f32 %v3214_v4, %v3659_v43  ;;  %v2974_v4 = vld [vmem:[#allocation7 + $0x84] sm:$0xf0] }
 0x2e7   :  { %v3216_v35 = vpop.eup %3215  ;;  %885 = vmatpush.bf16.msra.mxu3 %v2320_v63  ;;  %v2335_v63 = vld [vmem:[#allocation7 + $0xd0] sm:$0xf] }
 0x2e8   :  { %v3218_v5 = vpop.eup %3217  ;;  %v577_v34 = vpop.xlane.xlu2 %576  ;;  %v588_v32 = vmul.f32 %v3216_v35, %v3661_v44  ;;  %v597_v45 = vmul.f32 %v589_v57, %v3415_v55  ;;  %v2351_v35 = vld [vmem:[#allocation7 + $0x110] sm:$0xf]  ;;  %v2983_v57 = vld [vmem:[#allocation7 + $0x114] sm:$0xf0] }
 0x2e9   :  { %3219 = vrcp.f32 %v577_v34  ;;  %v592_v6 = vmul.f32 %v3218_v5, %v3656_v41 }
 0x2ea   :  { %v596_v7 = vmul.f32 %v588_v32, %v3415_v55  ;;  %v611_v11 = vsel %vm153_vm4, %v597_v45, 0.0  ;;  %v2352_v45 = vor.u32 %v2983_v57, %v2351_v35 }
 0x2eb   :  { %v600_v17 = vmul.f32 %v592_v6, %v3425_v60  ;;  %612 = vadd.xlane.f32.xlu1 %v611_v11  ;;  %v2347_v6 = vld [vmem:[#allocation7 + $0x100] sm:$0xf] }
 0x2ec   :  { %v608_v27 = vsel %vm153_vm4, %v596_v7, 0.0  ;;  %898 = vmatpush.bf16.msrb.mxu0 %v2352_v45 }
 0x2ed   :  { %609 = vadd.xlane.f32.xlu0 %v608_v27  ;;  %v620_v43 = vsel %vm153_vm4, %v600_v17, 0.0  ;;  %v2316_v17 = vor.u32 %v2974_v4, %v2315_v31  ;;  %v2982_v27 = vld [vmem:[#allocation7 + $0x104] sm:$0xf0]  ;;  %v2979_v4 = vld [vmem:[#allocation7 + $0xd4] sm:$0xf0] }
 0x2ee   :  { %621 = vadd.xlane.f32.xlu2 %v620_v43 }
 0x2ef   :  { %v3220_v40 = vpop.eup %3219  ;;  %886 = vmatpush.bf16.msra.mxu3 %v2316_v17  ;;  %v2336_v17 = vor.u32 %v2979_v4, %v2335_v63  ;;  %v657_v4 = vld [vmem:[#allocation2 + $0xa1] ss:$8 sm:$0x3] }
 0x2f0   :  { %v593_v44 = vmul.f32 %v3220_v40, %v3669_v50 }
 0x2f2   :  { %v601_v15 = vmul.f32 %v593_v44, %v3425_v60  ;;  %v2967_v60 = vld [vmem:[#allocation7 + $0x14] sm:$0xf0] }
 0x2f3   :  { %v2282_v1 = vor.u32 %v2967_v60, %v2281_v25 }
 0x2f4   :  { %v623_v41 = vsel %vm153_vm4, %v601_v15, 0.0  ;;  %v2311_v15 = vld [vmem:[#allocation7 + $0x70] sm:$0xf] }
 0x2f5   :  { %624 = vadd.xlane.f32.xlu0 %v623_v41  ;;  %732 = vmatpush.bf16.msra.mxu1 %v2282_v1  ;;  %v2973_v41 = vld [vmem:[#allocation7 + $0x74] sm:$0xf0] }
 0x2f9   :  { %733 = vmatpush.bf16.msra.mxu1 %v2274_v14 }
 0x30d   :  { %v412_v46 = vpop.xlane.xlu2 %411 }
 0x30e   :  { %v427_v59 = vmul.f32 %v3727_v61, %v412_v46  ;;  %v3761_v46 = vstv %s3737_s3 }
 0x310   :  { %v435_v49 = vadd.f32 %v427_v59, %v3731_v12  ;;  %v2312_v59 = vor.u32 %v2973_v41, %v2311_v15 }
 0x312   :  { %v444_v11 = vadd.f32 %v3746_v52, %v435_v49  ;;  %887 = vmatpush.bf16.msra.mxu3 %v2312_v59 }
 0x326   :  { %v400_v18 = vpop.xlane.xlu0 %399 }
 0x327   :  { %v423_v37 = vmul.f32 %v3727_v61, %v400_v18 }
 0x329   :  { %v431_v16 = vadd.f32 %v423_v37, %v3731_v12  ;;  %v2307_v37 = vld [vmem:[#allocation7 + $0x60] sm:$0xf] }
 0x32b   :  { %v440_v43 = vadd.f32 %v3746_v52, %v431_v16 }
 0x32e   :  { %v415_v21 = vpop.xlane.xlu0 %414 }
 0x32f   :  { %v428_v39 = vmul.f32 %v3727_v61, %v415_v21  ;;  %v2343_v21 = vld [vmem:[#allocation7 + $0xf0] sm:$0xf] }
 0x331   :  { %v436_v0 = vadd.f32 %v428_v39, %v3731_v12  ;;  %v2972_v39 = vld [vmem:[#allocation7 + $0x64] sm:$0xf0] }
 0x332   :  { %v2308_v16 = vor.u32 %v2972_v39, %v2307_v37 }
 0x333   :  { %v445_v44 = vadd.f32 %v3746_v52, %v436_v0  ;;  %v680_v0 = vand.u32 127, %v177_v22 }
 0x334   :  { %888 = vmatpush.bf16.msra.mxu3 %v2308_v16  ;;  %v2323_v16 = vld [vmem:[#allocation7 + $0xa0] sm:$0xf] }
 0x335   :  { %v682_v22 = vadd.s32 4294967288, %v680_v0 }
 0x336   :  { %v403_v55 = vpop.xlane.xlu1 %402 }
 0x337   :  { %v424_v8 = vmul.f32 %v3727_v61, %v403_v55  ;;  %v2348_v55 = vor.u32 %v2982_v27, %v2347_v6  ;;  %v686_v27 = vadd.s32 4294967280, %v680_v0 }
 0x339   :  { %v432_v9 = vadd.f32 %v424_v8, %v3731_v12  ;;  %899 = vmatpush.bf16.msrb.mxu0 %v2348_v55 }
 0x33b   :  { %v441_v26 = vadd.f32 %v3746_v52, %v432_v9 }
 0x33e   :  { %v3723_v28 = vpop.xlane.xlu0 %417 }
 0x33f   :  { %v406_v36 = vpop.xlane.xlu1 %405  ;;  %v429_v18 = vmul.f32 %v3727_v61, %v3723_v28 }
 0x340   :  { %v425_v23 = vmul.f32 %v3727_v61, %v406_v36 }
 0x341   :  { %v437_v20 = vadd.f32 %v429_v18, %v3731_v12 }
 0x342   :  { %v433_v7 = vadd.f32 %v425_v23, %v3731_v12 }
 0x344   :  { %v442_v33 = vadd.f32 %v3746_v52, %v433_v7  ;;  %v2299_v7 = vld [vmem:[#allocation7 + $0x40] sm:$0xf] }
 0x346   :  { %v409_v19 = vpop.xlane.xlu2 %408 }
 0x347   :  { %v426_v42 = vmul.f32 %v3727_v61, %v409_v19 }
 0x349   :  { %v434_v3 = vadd.f32 %v426_v42, %v3731_v12  ;;  %v2339_v42 = vld [vmem:[#allocation7 + $0xe0] sm:$0xf] }
 0x34b   :  { %v443_v36 = vadd.f32 %v3746_v52, %v434_v3  ;;  %v446_v3 = vadd.f32 %v3746_v52, %v437_v20  ;;  %v2969_v20 = vld [vmem:[#allocation7 + $0x34] sm:$0xf0] }
 0x34e   :  { %v3721_v62 = vpop.xlane.xlu1 %420 }
 0x34f   :  { %v604_v50 = vpop.xlane.xlu2 %603  ;;  %v430_v8 = vmul.f32 %v3727_v61, %v3721_v62 }
 0x350   :  { %v627_v5 = vmul.f32 %v3742_v30, %v604_v50  ;;  %v2981_v50 = vld [vmem:[#allocation7 + $0xf4] sm:$0xf0] }
 0x351   :  { %v2344_v14 = vor.u32 %v2981_v50, %v2343_v21  ;;  %v438_v49 = vadd.f32 %v430_v8, %v3731_v12 }
 0x352   :  { %v635_v25 = vadd.f32 %v627_v5, %v440_v43 }
 0x353   :  { %900 = vmatpush.bf16.msrb.mxu0 %v2344_v14  ;;  %v447_v5 = vadd.f32 %v3746_v52, %v438_v49  ;;  %v2295_v14 = vld [vmem:[#allocation7 + $0x30] sm:$0xf] }
 0x354   :  { %v644_v62 = vadd.f32 %v3761_v46, %v635_v25  ;;  %v2327_v49 = vld [vmem:[#allocation7 + $0xb0] sm:$0xf] }
 0x356   :  { %v616_v47 = vpop.xlane.xlu1 %615 }
 0x357   :  { %v607_v48 = vpop.xlane.xlu0 %606  ;;  %v631_v32 = vmul.f32 %v3742_v30, %v616_v47  ;;  %v2980_v47 = vld [vmem:[#allocation7 + $0xe4] sm:$0xf0] }
 0x358   :  { %v619_v38 = vpop.xlane.xlu2 %618  ;;  %v628_v13 = vmul.f32 %v3742_v30, %v607_v48  ;;  %v2340_v31 = vor.u32 %v2980_v47, %v2339_v42  ;;  %v2331_v42 = vld [vmem:[#allocation7 + $0xc0] sm:$0xf]  ;;  %v2978_v47 = vld [vmem:[#allocation7 + $0xc4] sm:$0xf0] }
 0x359   :  { %v632_v34 = vmul.f32 %v3742_v30, %v619_v38  ;;  %v639_v51 = vadd.f32 %v631_v32, %v444_v11  ;;  %v2304_v32 = vor.u32 %v2971_v2, %v2303_v56  ;;  %v2970_v11 = vld [vmem:[#allocation7 + $0x44] sm:$0xf0]  ;;  %v2434_v56 = vld [vmem:[%s3920_s4 + $0x20] sm:$0xf] }
 0x35a   :  { %v636_v40 = vadd.f32 %v628_v13, %v441_v26  ;;  %901 = vmatpush.bf16.msrb.mxu0 %v2340_v31  ;;  %v3005_v2 = vld [vmem:[%s3920_s4 + $0x2c] sm:$0xf0]  ;;  %v2418_v31 = vld [vmem:[%s3920_s4] sm:$0xf] }
 0x35b   :  { %v640_v60 = vadd.f32 %v632_v34, %v445_v44  ;;  %v648_v53 = vadd.f32 %v3761_v46, %v639_v51  ;;  %889 = vmatpush.bf16.msra.mxu3 %v2304_v32 }
 0x35c   :  { %v645_v10 = vadd.f32 %v3761_v46, %v636_v40 }
 0x35d   :  { %v649_v61 = vadd.f32 %v3761_v46, %v640_v60 }
 0x35e   :  { %v613_v19 = vpop.xlane.xlu1 %612  ;;  %v658_v13 = vpack.c.bf16 %v645_v10, %v644_v62  ;;  %902 = vmatpush.bf16.msrb.mxu0 %v2336_v17  ;;  %v2332_v62 = vor.u32 %v2978_v47, %v2331_v42  ;;  %v2375_v17 = vld [vmem:[#allocation7 + $0x170] sm:$0xf]  ;;  %v3021_v42 = vld [vmem:[#allocation9 + $0x6c] sm:$0xf0] }
 0x35f   :  { %v630_v29 = vmul.f32 %v3742_v30, %v613_v19  ;;  %v660_v35 = vpack.c.bf16 %v649_v61, %v648_v53  ;;  %v2291_v61 = vld [vmem:[#allocation7 + $0x20] sm:$0xf]  ;;  %v2968_v53 = vld [vmem:[#allocation7 + $0x24] sm:$0xf0] }
 0x360   :  { %v610_v1 = vpop.xlane.xlu0 %609  ;;  %v671_v45 = vunpack.c.l.b16 %v658_v13  ;;  %v672_v6 = vunpack.c.h.b16 %v658_v13 }
 0x361   :  { %v629_v28 = vmul.f32 %v3742_v30, %v610_v1  ;;  %v622_v24 = vpop.xlane.xlu2 %621  ;;  %v638_v58 = vadd.f32 %v630_v29, %v443_v36  ;;  %v675_v44 = vunpack.c.l.b16 %v660_v35  ;;  %v676_v15 = vunpack.c.h.b16 %v660_v35 }
 0x362   :  { %v633_v38 = vmul.f32 %v3742_v30, %v622_v24  ;;  %v681_v55 = vperm.slane %v671_v45, %v680_v0  ;;  %v683_v18 = vperm.slane %v672_v6, %v682_v22  ;;  %v690_v36 = vadd.s32 4294967272, %v680_v0  ;;  %903 = vmatpush.bf16.msrb.mxu0 %v2332_v62  ;;  %v2990_v45 = vld [vmem:[#allocation7 + $0x184] sm:$0xf0]  ;;  %v2486_v62 = vld [vmem:[#allocation9 + $0x40] sm:$0xf] }
 0x363   :  { %v637_v9 = vadd.f32 %v629_v28, %v442_v33  ;;  %v647_v48 = vadd.f32 %v3761_v46, %v638_v58  ;;  %v694_v25 = vperm.slane %v675_v44, %v680_v0  ;;  %v695_v60 = vperm.slane %v676_v15, %v682_v22  ;;  %v2976_v0 = vld [vmem:[#allocation7 + $0xa4] sm:$0xf0]  ;;  %v2379_v22 = vld [vmem:[#allocation7 + $0x180] sm:$0xf]  ;;  %v2566_v15 = vld [vmem:[#allocation9 + $0xe0] sm:$0xf] }
 0x364   :  { %v641_v57 = vadd.f32 %v633_v38, %v446_v3  ;;  %v685_v29 = vsel %vm684_vm5, %v683_v18, %v681_v55  ;;  %v2324_v13 = vor.u32 %v2976_v0, %v2323_v16  ;;  %v2435_v3 = vor.u32 %v3005_v2, %v2434_v56  ;;  %v2371_v55 = vld [vmem:[#allocation7 + $0x160] sm:$0xf]  ;;  %v2988_v18 = vld [vmem:[#allocation7 + $0x164] sm:$0xf0]  ;;  %v3035_v0 = vld [vmem:[#allocation9 + $0xe4] sm:$0xf] }
 0x365   :  { %v646_v23 = vadd.f32 %v3761_v46, %v637_v9  ;;  %v696_v59 = vsel %vm684_vm5, %v695_v60, %v694_v25  ;;  %v2296_v9 = vor.u32 %v2969_v20, %v2295_v14  ;;  %v663_v35 = vperm.slane %v657_v4, 0  ;;  %v3033_v25 = vld [vmem:[#allocation9 + $0xcc] sm:$0xf0] }
 0x366   :  { %v650_v41 = vadd.f32 %v3761_v46, %v641_v57  ;;  %v2372_v60 = vor.u32 %v2988_v18, %v2371_v55  ;;  %v3009_v16 = vld [vmem:[#allocation9 + $0xc] sm:$0xf0]  ;;  %v2472_v55 = vld [vmem:[#allocation9 + $0x30] sm:$0xf0] }
 0x367   :  { %v659_v26 = vpack.c.bf16 %v647_v48, %v646_v23  ;;  %v2292_v48 = vor.u32 %v2968_v53, %v2291_v61  ;;  %v2977_v23 = vld [vmem:[#allocation7 + $0xb4] sm:$0xf0]  ;;  %v3017_v61 = vld [vmem:[#allocation9 + $0x4c] sm:$0xf0] }
 0x368   :  { %v625_v12 = vpop.xlane.xlu0 %624  ;;  %v2328_v38 = vor.u32 %v2977_v23, %v2327_v49  ;;  %v2487_v53 = vor.u32 %v3017_v61, %v2486_v62  ;;  %v3013_v49 = vld [vmem:[#allocation9 + $0x2c] sm:$0xf0]  ;;  %v2558_v61 = vld [vmem:[#allocation9 + $0xc8] sm:$0xf] }
 0x369   :  { %v634_v34 = vmul.f32 %v3742_v30, %v625_v12  ;;  %v673_v43 = vunpack.c.l.b16 %v659_v26  ;;  %v2300_v30 = vor.u32 %v2970_v11, %v2299_v7  ;;  %v674_v19 = vunpack.c.h.b16 %v659_v26  ;;  %v3001_v26 = vld [vmem:[%s3920_s4 + $0xc] sm:$0xf0]  ;;  %v2383_v12 = vld [vmem:[#allocation7 + $0x190] sm:$0xf] }
 0x36a   :  { %904 = vmatpush.bf16.msrb.mxu0 %v2328_v38  ;;  %v2419_v63 = vor.u32 %v3001_v26, %v2418_v31  ;;  %v664_v7 = vperm.slane %v657_v4, 1  ;;  %v2380_v11 = vor.u32 %v2990_v45, %v2379_v22  ;;  %v2454_v38 = vld [vmem:[#allocation9] sm:$0xf]  ;;  %v3031_v31 = vld [vmem:[#allocation9 + $0xc4] sm:$0xf] }
 0x36b   :  { %v642_v40 = vadd.f32 %v634_v34, %v447_v5  ;;  %v687_v21 = vperm.slane %v673_v43, %v686_v27  ;;  %890 = vmatpush.bf16.msra.mxu3 %v2300_v30  ;;  %v691_v8 = vperm.slane %v674_v19, %v690_v36  ;;  %v2991_v5 = vld [vmem:[#allocation7 + $0x194] sm:$0xf0]  ;;  %v2455_v56 = vor.u32 %v3009_v16, %v2454_v38  ;;  %v3023_v22 = vld [vmem:[#allocation9 + $0x84] sm:$0xf]  ;;  %v3030_v38 = vld [vmem:[#allocation9 + $0xb4] sm:$0xf0] }
 0x36c   :  { %v2384_v32 = vor.u32 %v2991_v5, %v2383_v12  ;;  %v2985_v4 = vld [vmem:[#allocation7 + $0x134] sm:$0xf0] }
 0x36d   :  { %v651_v52 = vadd.f32 %v3761_v46, %v642_v40  ;;  %v689_v46 = vsel %vm688_vm6, %v687_v21, %v685_v29 }
 0x36e   :  { %v693_v24 = vsel %vm692_vm7, %v691_v8, %v689_v46  ;;  %905 = vmatpush.bf16.msrb.mxu0 %v2324_v13  ;;  %978 = vmatpush.bf16.msrb.mxu1 %v2384_v32  ;;  %v2534_v46 = vld [vmem:[#allocation9 + $0xa0] sm:$0xf]  ;;  %v2568_v13 = vld [vmem:[#allocation9 + $0xf0] sm:$0xf0]  ;;  %v2984_v32 = vld [vmem:[#allocation7 + $0x124] sm:$0xf0] }
 0x36f   :  { %v661_v50 = vpack.c.bf16 %v651_v52, %v650_v41  ;;  %891 = vmatpush.bf16.msra.mxu3 %v2296_v9  ;;  %v3037_v41 = vld [vmem:[#allocation9 + $0xec] sm:$0xf0]  ;;  %v2502_v9 = vld [vmem:[#allocation9 + $0x60] sm:$0xf]  ;;  %v2571_v2 = vor.u32 %v3035_v0, %v2568_v13  ;;  %v2526_v0 = vld [vmem:[#allocation9 + $0x88] sm:$0xf] }
 0x370   :  { %v2567_v19 = vor.u32 %v3037_v41, %v2566_v15  ;;  %v2503_v47 = vor.u32 %v3021_v42, %v2502_v9  ;;  %v3003_v15 = vld [vmem:[%s3920_s4 + $0x24] sm:$0xf]  ;;  %v2436_v41 = vld [vmem:[%s3920_s4 + $0x30] sm:$0xf0]  ;;  %v3038_v9 = vld [vmem:[#allocation9 + $0xf4] sm:$0xf0] }
 0x371   :  { %v677_v51 = vunpack.c.l.b16 %v661_v50  ;;  %v678_v1 = vunpack.c.h.b16 %v661_v50  ;;  %v2550_v50 = vld [vmem:[#allocation9 + $0xc0] sm:$0xf]  ;;  %v3026_v13 = vld [vmem:[#allocation9 + $0x94] sm:$0xf0] }
 0x372   :  { %1173 = vmatpush.bf16.msra.mxu0 %v2435_v3  ;;  %979 = vmatpush.bf16.msrb.mxu1 %v2380_v11  ;;  %v2551_v8 = vor.u32 %v3033_v25, %v2550_v50  ;;  %v2552_v3 = vld [vmem:[#allocation9 + $0xd0] sm:$0xf0]  ;;  %v3019_v11 = vld [vmem:[#allocation9 + $0x64] sm:$0xf] }
 0x373   :  { %v697_v33 = vperm.slane %v677_v51, %v686_v27  ;;  %v699_v28 = vperm.slane %v678_v1, %v690_v36  ;;  %892 = vmatpush.bf16.msra.mxu3 %v2292_v48  ;;  %v2989_v27 = vld [vmem:[#allocation7 + $0x174] sm:$0xf0]  ;;  %v2367_v51 = vld [vmem:[#allocation7 + $0x150] sm:$0xf]  ;;  %v2555_v26 = vor.u32 %v3031_v31, %v2552_v3  ;;  %v2456_v25 = vld [vmem:[#allocation9 + $0x10] sm:$0xf0] }
 0x374   :  { %v2376_v52 = vor.u32 %v2989_v27, %v2375_v17  ;;  %v2987_v1 = vld [vmem:[#allocation7 + $0x154] sm:$0xf0]  ;;  %v2470_v48 = vld [vmem:[#allocation9 + $0x20] sm:$0xf]  ;;  %v2504_v17 = vld [vmem:[#allocation9 + $0x70] sm:$0xf0] }
 0x375   :  { %v698_v10 = vsel %vm688_vm6, %v697_v33, %v696_v59  ;;  %v3029_v33 = vld [vmem:[#allocation9 + $0xac] sm:$0xf0]  ;;  %v2471_v23 = vor.u32 %v3013_v49, %v2470_v48  ;;  %v2507_v27 = vor.u32 %v3019_v11, %v2504_v17  ;;  %v3022_v31 = vld [vmem:[#allocation9 + $0x74] sm:$0xf0]  ;;  %v2560_v11 = vld [vmem:[#allocation9 + $0xd8] sm:$0xf0] }
 0x376   :  { %v700_v58 = vsel %vm692_vm7, %v699_v28, %v698_v10  ;;  %1174 = vmatpush.bf16.msra.mxu0 %v2419_v63  ;;  %980 = vmatpush.bf16.msrb.mxu1 %v2376_v52  ;;  %v2368_v28 = vor.u32 %v2987_v1, %v2367_v51  ;;  %v2363_v59 = vld [vmem:[#allocation7 + $0x140] sm:$0xf]  ;;  %v2986_v10 = vld [vmem:[#allocation7 + $0x144] sm:$0xf0]  ;;  %v2359_v63 = vld [vmem:[#allocation7 + $0x130] sm:$0xf] }
 0x377   :  { %v701_v37 = vsel %vm151_vm3, %v700_v58, %v693_v24  ;;  %v2535_v24 = vor.u32 %v3029_v33, %v2534_v46  ;;  %v2518_v58 = vld [vmem:[#allocation9 + $0x80] sm:$0xf]  ;;  %v2364_v14 = vor.u32 %v2986_v10, %v2363_v59  ;;  %v2360_v12 = vor.u32 %v2985_v4, %v2359_v63  ;;  %v3011_v52 = vld [vmem:[#allocation9 + $0x24] sm:$0xf]  ;;  %v786_v51 = vld [vmem:[#allocation2 + $0xa2] ss:$0 sm:$0xff] }
 0x378   :  { %v3785_v39 = vpack.c.b16 %v701_v37, %v701_v37  ;;  %v3025_v37 = vld [vmem:[#allocation9 + $0x8c] sm:$0xf0]  ;;  %v2475_v18 = vor.u32 %v3011_v52, %v2472_v55  ;;  %v3018_v63 = vld [vmem:[#allocation9 + $0x54] sm:$0xf0]  ;;  %v2694_v17 = vld [vmem:[#allocation9 + $0x1e0] sm:$0xf] }
 0x379   :  { %v2519_v20 = vor.u32 %v3025_v37, %v2518_v58  ;;  %v2544_v52 = vld [vmem:[#allocation9 + $0xb8] sm:$0xf0]  ;;  %v2662_v55 = vld [vmem:[#allocation9 + $0x1a0] sm:$0xf] }
 0x37a   :  { %2287 = vmatmul.msk.bf16.vlgmr.msra.gmra.mxu1 %vm153_vm4, %v3785_v39  ;;  %2288 = vmatmul.msk.bf16.vlgmr.msra.gmra.mxu2 %vm153_vm4, %v3785_v39 }
 0x37b   :  { %981 = vmatpush.bf16.msrb.mxu1 %v2372_v60 }
 0x37f   :  { %982 = vmatpush.bf16.msrb.mxu1 %v2368_v28 }
 0x383   :  { %983 = vmatpush.bf16.msrb.mxu1 %v2364_v14 }
 0x387   :  { %984 = vmatpush.bf16.msrb.mxu1 %v2360_v12  ;;  %v3014_v12 = vld [vmem:[#allocation9 + $0x34] sm:$0xf0] }
 0x3f7   :  { %v735_v57 = vpop.f32.mrf.mxu1 }
 0x3f8   :  { %v736_v34 = vadd.f32 %v735_v57, %v663_v35  ;;  %v3027_v35 = vld [vmem:[#allocation9 + $0xa4] sm:$0xf]  ;;  %v2536_v57 = vld [vmem:[#allocation9 + $0xb0] sm:$0xf0] }
 0x3f9   :  { %v2539_v5 = vor.u32 %v3027_v35, %v2536_v57  ;;  %v2478_v35 = vld [vmem:[#allocation9 + $0x28] sm:$0xf] }
 0x3fa   :  { %v752_v6 = vmax.f32 %v736_v34, 0.0  ;;  %v2355_v34 = vld [vmem:[#allocation7 + $0x120] sm:$0xf]  ;;  %v2479_v57 = vor.u32 %v3014_v12, %v2478_v35  ;;  %v2696_v35 = vld [vmem:[#allocation9 + $0x1f0] sm:$0xf0] }
 0x3fb   :  { %v2356_v45 = vor.u32 %v2984_v32, %v2355_v34  ;;  %v3010_v34 = vld [vmem:[#allocation9 + $0x14] sm:$0xf0]  ;;  %v3036_v32 = vld [vmem:[#allocation9 + $0xec] sm:$0xf] }
 0x3fc   :  { %v787_v43 = vpack.c.bf16 %v752_v6, %v752_v6  ;;  %v2520_v6 = vld [vmem:[#allocation9 + $0x90] sm:$0xf0] }
 0x3fd   :  { %v748_v40 = vpop.f32.mrf.mxu2  ;;  %985 = vmatpush.bf16.msrb.mxu1 %v2356_v45 }
 0x3fe   :  { %v749_v44 = vadd.f32 %v748_v40, %v664_v7  ;;  %893 = vmatmul.bf16.vlgmr.msra.gmra.mxu3 %v787_v43  ;;  %v2523_v7 = vor.u32 %v3023_v22, %v2520_v6  ;;  %v3015_v43 = vld [vmem:[#allocation9 + $0x44] sm:$0xf]  ;;  %v2488_v40 = vld [vmem:[#allocation9 + $0x50] sm:$0xf0]  ;;  %v2576_v22 = vld [vmem:[#allocation9 + $0xf8] sm:$0xf0] }
 0x3ff   :  { %v737_v30 = vpop.f32.mrf.mxu1  ;;  %v2579_v6 = vor.u32 %v3036_v32, %v2576_v22  ;;  %v2391_v22 = vld [vmem:[#allocation7 + $0x1b0] sm:$0xf] }
 0x400   :  { %v753_v36 = vmax.f32 %v749_v44, 0.0  ;;  %v2491_v44 = vor.u32 %v3015_v43, %v2488_v40  ;;  %v2439_v30 = vor.u32 %v3003_v15, %v2436_v41  ;;  %v2678_v43 = vld [vmem:[#allocation9 + $0x1c0] sm:$0xf]  ;;  %v3065_v15 = vld [vmem:[#allocation9 + $0x1cc] sm:$0xf0] }
 0x401   :  { %v3028_v41 = vld [vmem:[#allocation9 + $0xac] sm:$0xf] }
 0x402   :  { %v788_v21 = vpack.c.bf16 %v753_v36, %v753_v36  ;;  %1186 = vmatpush.bf16.msra.mxu1 %v2439_v30  ;;  %v2999_v36 = vld [vmem:[%s3920_s4 + $0x4] sm:$0xf]  ;;  %v2679_v30 = vor.u32 %v3065_v15, %v2678_v43  ;;  %v2992_v43 = vld [vmem:[#allocation7 + $0x1a4] sm:$0xf0]  ;;  %v2648_v15 = vld [vmem:[#allocation9 + $0x190] sm:$0xf0] }
 0x404   :  { %906 = vmatmul.bf16.vlgmr.msrb.gmra.mxu0 %v788_v21  ;;  %v3007_v21 = vld [vmem:[#allocation9 + $0x4] sm:$0xf] }
 0x405   :  { %v750_v29 = vpop.f32.mrf.mxu2  ;;  %2004 = vmatpush.bf16.msrb.mxu0 %v2567_v19  ;;  %v2420_v19 = vld [vmem:[%s3920_s4 + $0x10] sm:$0xf0]  ;;  %v2459_v60 = vor.u32 %v3007_v21, %v2456_v25  ;;  %v2995_v21 = vld [vmem:[#allocation7 + $0x1d4] sm:$0xf0] }
 0x406   :  { %v2423_v50 = vor.u32 %v2999_v36, %v2420_v19  ;;  %v2399_v36 = vld [vmem:[#allocation7 + $0x1d0] sm:$0xf]  ;;  %v2547_v19 = vor.u32 %v3028_v41, %v2544_v52  ;;  %v2528_v25 = vld [vmem:[#allocation9 + $0x98] sm:$0xf0]  ;;  %v2632_v52 = vld [vmem:[#allocation9 + $0x170] sm:$0xf0] }
 0x408   :  { %1187 = vmatpush.bf16.msra.mxu1 %v2423_v50  ;;  %v3024_v50 = vld [vmem:[#allocation9 + $0x8c] sm:$0xf] }
 0x409   :  { %2005 = vmatpush.bf16.msrb.mxu0 %v2551_v8 }
 0x40d   :  { %2006 = vmatpush.bf16.msrb.mxu0 %v2535_v24  ;;  %v3817_v24 = vld [vmem:[#allocation2 + $0xa7] ss:$8 sm:$0xf] }
 0x40e   :  { %v1119_v58 = vperm.slane %v3817_v24, 0 }
 0x411   :  { %2007 = vmatpush.bf16.msrb.mxu0 %v2519_v20  ;;  %v2574_v20 = vld [vmem:[#allocation9 + $0xe8] sm:$0xf] }
 0x414   :  { %2448 = vmatmul.msk.bf16.vlgmr.msra.gmra.mxu0 %vm153_vm4, %v3785_v39 }
 0x415   :  { %2008 = vmatpush.bf16.msrb.mxu0 %v2503_v47  ;;  %v2575_v47 = vor.u32 %v3038_v9, %v2574_v20  ;;  %v3016_v9 = vld [vmem:[#allocation9 + $0x4c] sm:$0xf] }
 0x419   :  { %2009 = vmatpush.bf16.msrb.mxu0 %v2487_v53  ;;  %v3034_v53 = vld [vmem:[#allocation9 + $0xd4] sm:$0xf0] }
 0x41a   :  { %v2559_v49 = vor.u32 %v3034_v53, %v2558_v61  ;;  %v2614_v61 = vld [vmem:[#allocation9 + $0x140] sm:$0xf]  ;;  %v3049_v53 = vld [vmem:[#allocation9 + $0x14c] sm:$0xf0] }
 0x41d   :  { %2010 = vmatpush.bf16.msrb.mxu0 %v2471_v23  ;;  %v2542_v23 = vld [vmem:[#allocation9 + $0xa8] sm:$0xf] }
 0x41e   :  { %v2543_v16 = vor.u32 %v3030_v38, %v2542_v23  ;;  %v2480_v23 = vld [vmem:[#allocation9 + $0x38] sm:$0xf0]  ;;  %v2615_v38 = vor.u32 %v3049_v53, %v2614_v61  ;;  %v2686_v61 = vld [vmem:[#allocation9 + $0x1c8] sm:$0xf]  ;;  %v3066_v53 = vld [vmem:[#allocation9 + $0x1d4] sm:$0xf0] }
 0x421   :  { %2011 = vmatpush.bf16.msrb.mxu0 %v2455_v56  ;;  %v2527_v56 = vor.u32 %v3026_v13, %v2526_v0  ;;  %v3045_v0 = vld [vmem:[#allocation9 + $0x12c] sm:$0xf0] }
 0x425   :  { %2056 = vmatpush.bf16.msra.mxu0 %v2571_v2  ;;  %v2510_v2 = vld [vmem:[#allocation9 + $0x68] sm:$0xf] }
 0x426   :  { %v2511_v3 = vor.u32 %v3022_v31, %v2510_v2  ;;  %v2464_v2 = vld [vmem:[#allocation9 + $0x18] sm:$0xf0] }
 0x429   :  { %2057 = vmatpush.bf16.msra.mxu0 %v2555_v26  ;;  %v2494_v26 = vld [vmem:[#allocation9 + $0x48] sm:$0xf] }
 0x42a   :  { %v2495_v4 = vor.u32 %v3018_v63, %v2494_v26  ;;  %v3041_v26 = vld [vmem:[#allocation9 + $0x10c] sm:$0xf0] }
 0x42d   :  { %2058 = vmatpush.bf16.msra.mxu0 %v2539_v5  ;;  %v2462_v5 = vld [vmem:[#allocation9 + $0x8] sm:$0xf] }
 0x42e   :  { %v2463_v45 = vor.u32 %v3010_v34, %v2462_v5  ;;  %v3063_v5 = vld [vmem:[#allocation9 + $0x1c4] sm:$0xf]  ;;  %v2680_v34 = vld [vmem:[#allocation9 + $0x1d0] sm:$0xf0] }
 0x42f   :  { %v2683_v32 = vor.u32 %v3063_v5, %v2680_v34  ;;  %v2606_v5 = vld [vmem:[#allocation9 + $0x128] sm:$0xf]  ;;  %v3046_v34 = vld [vmem:[#allocation9 + $0x134] sm:$0xf0] }
 0x431   :  { %2059 = vmatpush.bf16.msra.mxu0 %v2523_v7  ;;  %v3032_v7 = vld [vmem:[#allocation9 + $0xcc] sm:$0xf] }
 0x432   :  { %v2563_v40 = vor.u32 %v3032_v7, %v2560_v11  ;;  %v3059_v7 = vld [vmem:[#allocation9 + $0x1a4] sm:$0xf]  ;;  %v2664_v11 = vld [vmem:[#allocation9 + $0x1b0] sm:$0xf0] }
 0x435   :  { %2060 = vmatpush.bf16.msra.mxu0 %v2507_v27  ;;  %v3069_v27 = vld [vmem:[#allocation9 + $0x1ec] sm:$0xf0] }
 0x439   :  { %2061 = vmatpush.bf16.msra.mxu0 %v2491_v44  ;;  %v2695_v44 = vor.u32 %v3069_v27, %v2694_v17  ;;  %v2667_v17 = vor.u32 %v3059_v7, %v2664_v11  ;;  %v2387_v27 = vld [vmem:[#allocation7 + $0x1a0] sm:$0xf]  ;;  %v3068_v7 = vld [vmem:[#allocation9 + $0x1ec] sm:$0xf]  ;;  %v2704_v11 = vld [vmem:[#allocation9 + $0x1f8] sm:$0xf0] }
 0x43d   :  { %2062 = vmatpush.bf16.msra.mxu0 %v2475_v18  ;;  %v3061_v18 = vld [vmem:[#allocation9 + $0x1ac] sm:$0xf0] }
 0x441   :  { %2063 = vmatpush.bf16.msra.mxu0 %v2459_v60  ;;  %v2400_v60 = vor.u32 %v2995_v21, %v2399_v36  ;;  %v2600_v21 = vld [vmem:[#allocation9 + $0x130] sm:$0xf0] }
 0x443   :  { %1034 = vmatpush.bf16.msrb.mxu2 %v2400_v60  ;;  %v2584_v60 = vld [vmem:[#allocation9 + $0x110] sm:$0xf0] }
 0x481   :  { %v894_v1 = vpop.f32.mrf.mxu3  ;;  %v907_v29 = vpop.f32.mrf.mxu0 }
 0x482   :  { %v895_v8 = vadd.f32 %v894_v1, %v786_v51  ;;  %v2395_v51 = vld [vmem:[#allocation7 + $0x1c0] sm:$0xf]  ;;  %v2663_v1 = vor.u32 %v3061_v18, %v2662_v55  ;;  %v3047_v55 = vld [vmem:[#allocation9 + $0x144] sm:$0xf]  ;;  %v2616_v18 = vld [vmem:[#allocation9 + $0x150] sm:$0xf0] }
 0x483   :  { %v2619_v36 = vor.u32 %v3047_v55, %v2616_v18  ;;  %v2656_v55 = vld [vmem:[#allocation9 + $0x198] sm:$0xf0] }
 0x484   :  { %v908_v46 = vadd.f32 %v907_v29, %v895_v8  ;;  %v2994_v29 = vld [vmem:[#allocation7 + $0x1c4] sm:$0xf0]  ;;  %v2646_v8 = vld [vmem:[#allocation9 + $0x180] sm:$0xf] }
 0x486   :  { %v911_v33 = vmax.f32 %v908_v46, 0.0  ;;  %v3057_v46 = vld [vmem:[#allocation9 + $0x18c] sm:$0xf0] }
 0x488   :  { %v929_v28 = vpack.c.bf16 %v911_v33, %v911_v33  ;;  %v2396_v33 = vor.u32 %v2994_v29, %v2395_v51 }
 0x489   :  { %v896_v59 = vpop.f32.mrf.mxu3  ;;  %v909_v10 = vpop.f32.mrf.mxu0 }
 0x48a   :  { %986 = vmatmul.bf16.vlgmr.msrb.gmra.mxu1 %v929_v28  ;;  %v2531_v28 = vor.u32 %v3024_v50, %v2528_v25  ;;  %v3020_v59 = vld [vmem:[#allocation9 + $0x6c] sm:$0xf]  ;;  %v2512_v10 = vld [vmem:[#allocation9 + $0x78] sm:$0xf0]  ;;  %1035 = vmatpush.bf16.msrb.mxu2 %v2396_v33  ;;  %v3039_v25 = vld [vmem:[#allocation9 + $0x104] sm:$0xf] }
 0x48b   :  { %2017 = vmatpush.bf16.msrb.mxu1 %v2695_v44  ;;  %v2515_v20 = vor.u32 %v3020_v59, %v2512_v10  ;;  %v3055_v44 = vld [vmem:[#allocation9 + $0x184] sm:$0xf]  ;;  %v2587_v51 = vor.u32 %v3039_v25, %v2584_v60  ;;  %v1120_v59 = vperm.slane %v3817_v24, 1  ;;  %v2624_v25 = vld [vmem:[#allocation9 + $0x158] sm:$0xf0] }
 0x48c   :  { %v2651_v41 = vor.u32 %v3055_v44, %v2648_v15 }
 0x48f   :  { %2018 = vmatpush.bf16.msrb.mxu1 %v2679_v30 }
 0x491   :  { %v1176_v37 = vpop.f32.mrf.mxu0 }
 0x492   :  { %v1177_v14 = vadd.f32 %v1176_v37, %v1119_v58  ;;  %v2647_v58 = vor.u32 %v3057_v46, %v2646_v8  ;;  %v2630_v37 = vld [vmem:[#allocation9 + $0x160] sm:$0xf] }
 0x493   :  { %2019 = vmatpush.bf16.msrb.mxu1 %v2663_v1  ;;  %v928_v1 = vld [vmem:[#allocation2 + $0xa3] ss:$0 sm:$0xff] }
 0x494   :  { %v1219_v42 = vmax.f32 %v1177_v14, 0.0  ;;  %v3053_v14 = vld [vmem:[#allocation9 + $0x16c] sm:$0xf0] }
 0x496   :  { %v3820_v62 = vpack.c.bf16 %v1219_v42, %v1219_v42  ;;  %v2496_v42 = vld [vmem:[#allocation9 + $0x58] sm:$0xf0] }
 0x497   :  { %2020 = vmatpush.bf16.msrb.mxu1 %v2647_v58 }
 0x498   :  { %2012 = vmatmul.bf16.vlgmr.msrb.gmra.mxu0 %v3820_v62 }
 0x499   :  { %2108 = vmatpush.bf16.msrb.mxu0 %v2575_v47  ;;  %v1178_v48 = vpop.f32.mrf.mxu0  ;;  %v2631_v47 = vor.u32 %v3053_v14, %v2630_v37  ;;  %v2702_v14 = vld [vmem:[#allocation9 + $0x1e8] sm:$0xf] }
 0x49a   :  { %2449 = vmatmul.msk.bf16.vlgmr.msra.gmra.mxu1 %vm153_vm4, %v3785_v39  ;;  %v2499_v48 = vor.u32 %v3016_v9, %v2496_v42 }
 0x49b   :  { %2021 = vmatpush.bf16.msrb.mxu1 %v2631_v47 }
 0x49d   :  { %2109 = vmatpush.bf16.msrb.mxu0 %v2559_v49  ;;  %v3012_v49 = vld [vmem:[#allocation9 + $0x2c] sm:$0xf] }
 0x49e   :  { %v2483_v13 = vor.u32 %v3012_v49, %v2480_v23  ;;  %v2687_v23 = vor.u32 %v3066_v53, %v2686_v61  ;;  %v2442_v61 = vld [vmem:[%s3920_s4 + $0x28] sm:$0xf]  ;;  %v3006_v53 = vld [vmem:[%s3920_s4 + $0x34] sm:$0xf0] }
 0x49f   :  { %2022 = vmatpush.bf16.msrb.mxu1 %v2615_v38  ;;  %v2670_v38 = vld [vmem:[#allocation9 + $0x1a8] sm:$0xf] }
 0x4a1   :  { %2110 = vmatpush.bf16.msrb.mxu0 %v2543_v16  ;;  %v2598_v16 = vld [vmem:[#allocation9 + $0x120] sm:$0xf] }
 0x4a2   :  { %v2599_v31 = vor.u32 %v3045_v0, %v2598_v16  ;;  %v3062_v16 = vld [vmem:[#allocation9 + $0x1b4] sm:$0xf0] }
 0x4a3   :  { %v2671_v0 = vor.u32 %v3062_v16, %v2670_v38  ;;  %v1000_v38 = vld [vmem:[#allocation2 + $0xa4] ss:$0 sm:$0xff] }
 0x4a4   :  { %2023 = vmatpush.bf16.msrb.mxu1 %v2599_v31 }
 0x4a5   :  { %2111 = vmatpush.bf16.msrb.mxu0 %v2527_v56  ;;  %v3008_v56 = vld [vmem:[#allocation9 + $0xc] sm:$0xf] }
 0x4a6   :  { %v2467_v63 = vor.u32 %v3008_v56, %v2464_v2  ;;  %v3058_v56 = vld [vmem:[#allocation9 + $0x194] sm:$0xf0] }
 0x4a8   :  { %2064 = vmatmul.bf16.vlgmr.msra.gmra.mxu0 %v3820_v62 }
 0x4a9   :  { %2112 = vmatpush.bf16.msrb.mxu0 %v2511_v3  ;;  %v2582_v3 = vld [vmem:[#allocation9 + $0x100] sm:$0xf] }
 0x4aa   :  { %v2583_v12 = vor.u32 %v3041_v26, %v2582_v3  ;;  %v2638_v3 = vld [vmem:[#allocation9 + $0x168] sm:$0xf]  ;;  %v3054_v26 = vld [vmem:[#allocation9 + $0x174] sm:$0xf0] }
 0x4ac   :  { %2024 = vmatpush.bf16.msrb.mxu1 %v2583_v12 }
 0x4ad   :  { %2113 = vmatpush.bf16.msrb.mxu0 %v2495_v4  ;;  %v3067_v4 = vld [vmem:[#allocation9 + $0x1e4] sm:$0xf] }
 0x4b1   :  { %2114 = vmatpush.bf16.msrb.mxu0 %v2479_v57  ;;  %v2699_v57 = vor.u32 %v3067_v4, %v2696_v35  ;;  %v2622_v4 = vld [vmem:[#allocation9 + $0x148] sm:$0xf]  ;;  %v3050_v35 = vld [vmem:[#allocation9 + $0x154] sm:$0xf0] }
 0x4b3   :  { %2069 = vmatpush.bf16.msra.mxu1 %v2699_v57  ;;  %v2623_v57 = vor.u32 %v3050_v35, %v2622_v4 }
 0x4b5   :  { %2115 = vmatpush.bf16.msrb.mxu0 %v2463_v45  ;;  %v2993_v45 = vld [vmem:[#allocation7 + $0x1b4] sm:$0xf0] }
 0x4b7   :  { %2070 = vmatpush.bf16.msra.mxu1 %v2683_v32  ;;  %v2607_v32 = vor.u32 %v3046_v34, %v2606_v5 }
 0x4b8   :  { %2116 = vmatmul.bf16.vlgmr.msrb.gmra.mxu0 %v3820_v62 }
 0x4b9   :  { %2160 = vmatpush.bf16.msra.mxu0 %v2579_v6  ;;  %v2392_v6 = vor.u32 %v2993_v45, %v2391_v22  ;;  %v2590_v22 = vld [vmem:[#allocation9 + $0x108] sm:$0xf]  ;;  %v3042_v45 = vld [vmem:[#allocation9 + $0x114] sm:$0xf0] }
 0x4bb   :  { %1036 = vmatpush.bf16.msrb.mxu2 %v2392_v6  ;;  %2071 = vmatpush.bf16.msra.mxu1 %v2667_v17  ;;  %v2591_v17 = vor.u32 %v3042_v45, %v2590_v22 }
 0x4bd   :  { %2161 = vmatpush.bf16.msra.mxu0 %v2563_v40  ;;  %v2388_v40 = vor.u32 %v2992_v43, %v2387_v27  ;;  %v2707_v27 = vor.u32 %v3068_v7, %v2704_v11  ;;  %v3064_v43 = vld [vmem:[#allocation9 + $0x1cc] sm:$0xf] }
 0x4bf   :  { %1037 = vmatpush.bf16.msrb.mxu2 %v2388_v40  ;;  %2072 = vmatpush.bf16.msra.mxu1 %v2651_v41  ;;  %v2688_v40 = vld [vmem:[#allocation9 + $0x1d8] sm:$0xf0]  ;;  %v3060_v41 = vld [vmem:[#allocation9 + $0x1ac] sm:$0xf] }
 0x4c0   :  { %v2691_v44 = vor.u32 %v3064_v43, %v2688_v40  ;;  %v2806_v43 = vld [vmem:[#allocation9 + $0x2c0] sm:$0xf] }
 0x4c1   :  { %2162 = vmatpush.bf16.msra.mxu0 %v2547_v19  ;;  %v3043_v19 = vld [vmem:[#allocation9 + $0x124] sm:$0xf] }
 0x4c2   :  { %v2603_v50 = vor.u32 %v3043_v19, %v2600_v21  ;;  %v2640_v19 = vld [vmem:[#allocation9 + $0x178] sm:$0xf0] }
 0x4c5   :  { %2163 = vmatpush.bf16.msra.mxu0 %v2531_v28 }
 0x4c9   :  { %2164 = vmatpush.bf16.msra.mxu0 %v2515_v20  ;;  %v3070_v20 = vld [vmem:[#allocation9 + $0x1f4] sm:$0xf0] }
 0x4ca   :  { %v2703_v42 = vor.u32 %v3070_v20, %v2702_v14  ;;  %v2404_v20 = vld [vmem:[#allocation7 + $0x1e0] sm:$0xf] }
 0x4cd   :  { %2165 = vmatpush.bf16.msra.mxu0 %v2499_v48 }
 0x4d1   :  { %2166 = vmatpush.bf16.msra.mxu0 %v2483_v13  ;;  %v2654_v13 = vld [vmem:[#allocation9 + $0x188] sm:$0xf] }
 0x4d2   :  { %v2655_v31 = vor.u32 %v3058_v56, %v2654_v13  ;;  %v1109_v13 = vld [vmem:[#allocation2 + $0xc0] ss:$8 sm:$0xf] }
 0x4d3   :  { %v1358_v45 = vperm.slane %v1109_v13, 2 }
 0x4d5   :  { %2167 = vmatpush.bf16.msra.mxu0 %v2467_v63  ;;  %v2639_v63 = vor.u32 %v3054_v26, %v2638_v3 }
 0x4d8   :  { %2168 = vmatmul.bf16.vlgmr.msra.gmra.mxu0 %v3820_v62  ;;  %v3051_v62 = vld [vmem:[#allocation9 + $0x164] sm:$0xf] }
 0x4d9   :  { %v2635_v30 = vor.u32 %v3051_v62, %v2632_v52  ;;  %v2672_v62 = vld [vmem:[#allocation9 + $0x1b8] sm:$0xf0] }
 0x4da   :  { %v2675_v52 = vor.u32 %v3060_v41, %v2672_v62  ;;  %v2790_v62 = vld [vmem:[#allocation9 + $0x2a0] sm:$0xf] }
 0x4db   :  { %2073 = vmatpush.bf16.msra.mxu1 %v2635_v30  ;;  %v3056_v30 = vld [vmem:[#allocation9 + $0x18c] sm:$0xf] }
 0x4dc   :  { %v2659_v18 = vor.u32 %v3056_v30, %v2656_v55  ;;  %v2774_v30 = vld [vmem:[#allocation9 + $0x280] sm:$0xf]  ;;  %v3089_v55 = vld [vmem:[#allocation9 + $0x28c] sm:$0xf0] }
 0x4df   :  { %2074 = vmatpush.bf16.msra.mxu1 %v2619_v36  ;;  %v3052_v36 = vld [vmem:[#allocation9 + $0x16c] sm:$0xf] }
 0x4e0   :  { %v2643_v21 = vor.u32 %v3052_v36, %v2640_v19  ;;  %v3085_v36 = vld [vmem:[#allocation9 + $0x26c] sm:$0xf0] }
 0x4e3   :  { %2075 = vmatpush.bf16.msra.mxu1 %v2603_v50  ;;  %v3048_v50 = vld [vmem:[#allocation9 + $0x14c] sm:$0xf] }
 0x4e4   :  { %v2627_v60 = vor.u32 %v3048_v50, %v2624_v25  ;;  %v3081_v50 = vld [vmem:[#allocation9 + $0x24c] sm:$0xf0]  ;;  %v1359_v25 = vperm.slane %v1109_v13, 3 }
 0x4e7   :  { %2076 = vmatpush.bf16.msra.mxu1 %v2587_v51  ;;  %v3044_v51 = vld [vmem:[#allocation9 + $0x12c] sm:$0xf] }
 0x507   :  { %v987_v29 = vpop.f32.mrf.mxu1 }
 0x508   :  { %v988_v8 = vadd.f32 %v987_v29, %v928_v1  ;;  %v2608_v1 = vld [vmem:[#allocation9 + $0x138] sm:$0xf0] }
 0x509   :  { %v2611_v29 = vor.u32 %v3044_v51, %v2608_v1  ;;  %v2726_v51 = vld [vmem:[#allocation9 + $0x220] sm:$0xf]  ;;  %v3077_v1 = vld [vmem:[#allocation9 + $0x22c] sm:$0xf0] }
 0x50a   :  { %v991_v46 = vmax.f32 %v988_v8, 0.0  ;;  %v3040_v8 = vld [vmem:[#allocation9 + $0x10c] sm:$0xf] }
 0x50c   :  { %v1001_v33 = vpack.c.bf16 %v991_v46, %v991_v46  ;;  %v2592_v46 = vld [vmem:[#allocation9 + $0x118] sm:$0xf0] }
 0x50e   :  { %2401 = vmatmul.msk.bf16.vlgmr.msrb.gmra.mxu2 %vm1026_vm8, %v1001_v33 }
 0x50f   :  { %v989_v28 = vpop.f32.mrf.mxu1 }
 0x510   :  { %v2595_v28 = vor.u32 %v3040_v8, %v2592_v46  ;;  %v2727_v8 = vor.u32 %v3077_v1, %v2726_v51  ;;  %v3098_v51 = vld [vmem:[#allocation9 + $0x2d4] sm:$0xf0] }
 0x515   :  { %v3829_v10 = vpop.f32.mrf.mxu0 }
 0x517   :  { %v1189_v58 = vpop.f32.mrf.mxu1 }
 0x518   :  { %v1190_v37 = vadd.f32 %v1189_v58, %v1120_v59  ;;  %v2408_v58 = vld [vmem:[#allocation7 + $0x1f0] sm:$0xf] }
 0x51a   :  { %v1220_v9 = vmax.f32 %v1190_v37, 0.0  ;;  %v2997_v37 = vld [vmem:[#allocation7 + $0x1f4] sm:$0xf0] }
 0x51b   :  { %v2409_v14 = vor.u32 %v2997_v37, %v2408_v58  ;;  %v3099_v37 = vld [vmem:[#allocation9 + $0x2e4] sm:$0xf] }
 0x51c   :  { %v3831_v47 = vpack.c.bf16 %v1220_v9, %v1220_v9  ;;  %v2996_v9 = vld [vmem:[#allocation7 + $0x1e4] sm:$0xf0] }
 0x51d   :  { %v2015_v48 = vpop.f32.mrf.mxu0  ;;  %1071 = vmatpush.bf16.msra.mxu2 %v2409_v14  ;;  %v2824_v14 = vld [vmem:[#allocation9 + $0x2f0] sm:$0xf0] }
 0x51e   :  { %2025 = vmatmul.bf16.vlgmr.msrb.gmra.mxu1 %v3831_v47  ;;  %v2443_v48 = vor.u32 %v3006_v53, %v2442_v61  ;;  %v2808_v61 = vld [vmem:[#allocation9 + $0x2d0] sm:$0xf0] }
 0x51f   :  { %2121 = vmatpush.bf16.msrb.mxu1 %v2703_v42  ;;  %v1191_v49 = vpop.f32.mrf.mxu1  ;;  %v2405_v42 = vor.u32 %v2996_v9, %v2404_v20  ;;  %v2827_v9 = vor.u32 %v3099_v37, %v2824_v14  ;;  %v2766_v14 = vld [vmem:[#allocation9 + $0x268] sm:$0xf] }
 0x520   :  { %v3002_v49 = vld [vmem:[%s3920_s4 + $0x14] sm:$0xf0] }
 0x521   :  { %1072 = vmatpush.bf16.msra.mxu2 %v2405_v42  ;;  %v3095_v42 = vld [vmem:[#allocation9 + $0x2c4] sm:$0xf] }
 0x523   :  { %2122 = vmatpush.bf16.msrb.mxu1 %v2687_v23 }
 0x525   :  { %v3834_v2 = vpop.f32.mrf.mxu0  ;;  %1199 = vmatpush.bf16.msrb.mxu2 %v2443_v48  ;;  %v2811_v48 = vor.u32 %v3095_v42, %v2808_v61  ;;  %v2750_v42 = vld [vmem:[#allocation9 + $0x248] sm:$0xf]  ;;  %v3082_v61 = vld [vmem:[#allocation9 + $0x254] sm:$0xf0] }
 0x527   :  { %2123 = vmatpush.bf16.msrb.mxu1 %v2671_v0 }
 0x52b   :  { %2124 = vmatpush.bf16.msrb.mxu1 %v2655_v31  ;;  %v1356_v31 = vperm.slane %v1109_v13, 0 }
 0x52d   :  { %v2067_v12 = vpop.f32.mrf.mxu0 }
 0x52e   :  { %2077 = vmatmul.bf16.vlgmr.msra.gmra.mxu1 %v3831_v47 }
 0x52f   :  { %2125 = vmatpush.bf16.msrb.mxu1 %v2639_v63  ;;  %v2014_v63 = vadd.f32 %v3829_v10, %v1356_v31  ;;  %v2822_v10 = vld [vmem:[#allocation9 + $0x2e0] sm:$0xf]  ;;  %v3083_v31 = vld [vmem:[#allocation9 + $0x264] sm:$0xf] }
 0x533   :  { %2126 = vmatpush.bf16.msrb.mxu1 %v2623_v57  ;;  %v1357_v57 = vperm.slane %v1109_v13, 1  ;;  %v2776_v13 = vld [vmem:[#allocation9 + $0x290] sm:$0xf0] }
 0x535   :  { %v3837_v6 = vpop.f32.mrf.mxu0  ;;  %v2066_v5 = vadd.f32 %v3834_v2, %v1357_v57  ;;  %v3093_v2 = vld [vmem:[#allocation9 + $0x2ac] sm:$0xf0]  ;;  %v3004_v57 = vld [vmem:[%s3920_s4 + $0x2c] sm:$0xf] }
 0x536   :  { %v2118_v7 = vadd.f32 %v3837_v6, %v1358_v45  ;;  %v2758_v6 = vld [vmem:[#allocation9 + $0x260] sm:$0xf]  ;;  %v2728_v45 = vld [vmem:[#allocation9 + $0x230] sm:$0xf0] }
 0x537   :  { %2127 = vmatpush.bf16.msrb.mxu1 %v2607_v32  ;;  %v2759_v19 = vor.u32 %v3085_v36, %v2758_v6  ;;  %v2830_v36 = vld [vmem:[#allocation9 + $0x2e8] sm:$0xf] }
 0x53b   :  { %2128 = vmatpush.bf16.msrb.mxu1 %v2591_v17 }
 0x53d   :  { %v2119_v15 = vpop.f32.mrf.mxu0 }
 0x53e   :  { %2129 = vmatmul.bf16.vlgmr.msrb.gmra.mxu1 %v3831_v47 }
 0x53f   :  { %2173 = vmatpush.bf16.msra.mxu1 %v2707_v27  ;;  %v3101_v27 = vld [vmem:[#allocation9 + $0x2ec] sm:$0xf0] }
 0x540   :  { %v2823_v40 = vor.u32 %v3101_v27, %v2822_v10  ;;  %v2428_v10 = vld [vmem:[%s3920_s4 + $0x18] sm:$0xf0] }
 0x543   :  { %2174 = vmatpush.bf16.msra.mxu1 %v2691_v44  ;;  %v3097_v44 = vld [vmem:[#allocation9 + $0x2cc] sm:$0xf0] }
 0x544   :  { %v2807_v41 = vor.u32 %v3097_v44, %v2806_v43  ;;  %v3071_v43 = vld [vmem:[#allocation9 + $0x204] sm:$0xf] }
 0x547   :  { %2175 = vmatpush.bf16.msra.mxu1 %v2675_v52  ;;  %v2791_v52 = vor.u32 %v3093_v2, %v2790_v62 }
 0x54b   :  { %2176 = vmatpush.bf16.msra.mxu1 %v2659_v18  ;;  %v2775_v18 = vor.u32 %v3089_v55, %v2774_v30  ;;  %v1121_v55 = vperm.slane %v3817_v24, 2  ;;  %v3094_v24 = vld [vmem:[#allocation9 + $0x2b4] sm:$0xf0] }
 0x54f   :  { %2177 = vmatpush.bf16.msra.mxu1 %v2643_v21  ;;  %v2742_v21 = vld [vmem:[#allocation9 + $0x240] sm:$0xf] }
 0x553   :  { %2178 = vmatpush.bf16.msra.mxu1 %v2627_v60  ;;  %v2743_v60 = vor.u32 %v3081_v50, %v2742_v21 }
 0x555   :  { %v3840_v33 = vpop.f32.mrf.mxu0 }
 0x557   :  { %2179 = vmatpush.bf16.msra.mxu1 %v2611_v29  ;;  %v2170_v29 = vadd.f32 %v3840_v33, %v1359_v25  ;;  %v3091_v33 = vld [vmem:[#allocation9 + $0x2a4] sm:$0xf] }
 0x55b   :  { %2180 = vmatpush.bf16.msra.mxu1 %v2595_v28  ;;  %v2710_v28 = vld [vmem:[#allocation9 + $0x200] sm:$0xf] }
 0x55d   :  { %v2171_v59 = vpop.f32.mrf.mxu0 }
 0x55e   :  { %2181 = vmatmul.bf16.vlgmr.msra.gmra.mxu1 %v3831_v47  ;;  %v2426_v47 = vld [vmem:[%s3920_s4 + $0x8] sm:$0xf] }
 0x55f   :  { %v2427_v23 = vor.u32 %v3002_v49, %v2426_v47  ;;  %v3073_v59 = vld [vmem:[#allocation9 + $0x20c] sm:$0xf0]  ;;  %v2792_v47 = vld [vmem:[#allocation9 + $0x2b0] sm:$0xf0] }
 0x560   :  { %v2711_v20 = vor.u32 %v3073_v59, %v2710_v28  ;;  %v2795_v49 = vor.u32 %v3091_v33, %v2792_v47  ;;  %v2782_v28 = vld [vmem:[#allocation9 + $0x288] sm:$0xf]  ;;  %v3090_v59 = vld [vmem:[#allocation9 + $0x294] sm:$0xf0] }
 0x561   :  { %1200 = vmatpush.bf16.msrb.mxu2 %v2427_v23  ;;  %v2413_v23 = vld [vmem:[#allocation7 + $0x200] sm:$0xf]  ;;  %v2783_v37 = vor.u32 %v3090_v59, %v2782_v28  ;;  %v2718_v47 = vld [vmem:[#allocation9 + $0x208] sm:$0xf]  ;;  %v2838_v59 = vld [vmem:[#allocation9 + $0x300] sm:$0xf] }
 0x591   :  { %v1039_v16 = vpop.f32.mrf.mxu2 }
 0x592   :  { %v1040_v0 = vadd.f32 %v1039_v16, %v1000_v38  ;;  %v2998_v38 = vld [vmem:[#allocation7 + $0x204] sm:$0xf0] }
 0x593   :  { %v2414_v16 = vor.u32 %v2998_v38, %v2413_v23  ;;  %v3100_v23 = vld [vmem:[#allocation9 + $0x2ec] sm:$0xf]  ;;  %v2832_v38 = vld [vmem:[#allocation9 + $0x2f8] sm:$0xf0] }
 0x594   :  { %v1043_v56 = vmax.f32 %v1040_v0, 0.0  ;;  %v3087_v0 = vld [vmem:[#allocation9 + $0x284] sm:$0xf] }
 0x595   :  { %1100 = vmatpush.bf16.msrb.mxu3 %v2414_v16 }
 0x596   :  { %v1049_v3 = vpack.c.bf16 %v1043_v56, %v1043_v56  ;;  %v2779_v56 = vor.u32 %v3087_v0, %v2776_v13  ;;  %v2835_v0 = vor.u32 %v3100_v23, %v2832_v38  ;;  %v3096_v13 = vld [vmem:[#allocation9 + $0x2cc] sm:$0xf]  ;;  %v3119_v23 = vld [vmem:[#allocation9 + $0x384] sm:$0xf]  ;;  %v2904_v38 = vld [vmem:[#allocation9 + $0x390] sm:$0xf0] }
 0x598   :  { %2410 = vmatmul.msk.bf16.vlgmr.msra.gmra.mxu2 %vm153_vm4, %v1049_v3  ;;  %v2760_v3 = vld [vmem:[#allocation9 + $0x270] sm:$0xf0] }
 0x599   :  { %v1041_v26 = vpop.f32.mrf.mxu2  ;;  %2030 = vmatpush.bf16.msra.mxu2 %v2823_v40  ;;  %v2712_v40 = vld [vmem:[#allocation9 + $0x210] sm:$0xf0] }
 0x59a   :  { %v3079_v26 = vld [vmem:[#allocation9 + $0x244] sm:$0xf]  ;;  %v2715_v44 = vor.u32 %v3071_v43, %v2712_v40  ;;  %v2902_v43 = vld [vmem:[#allocation9 + $0x380] sm:$0xf]  ;;  %v3121_v40 = vld [vmem:[#allocation9 + $0x38c] sm:$0xf0] }
 0x59b   :  { %v2026_v4 = vpop.f32.mrf.mxu1 }
 0x59c   :  { %v3857_v35 = vadd.f32 %v2026_v4, %v2014_v63  ;;  %v2763_v63 = vor.u32 %v3083_v31, %v2760_v3  ;;  %v2744_v4 = vld [vmem:[#allocation9 + $0x250] sm:$0xf0]  ;;  %v2950_v31 = vld [vmem:[#allocation9 + $0x3e0] sm:$0xf]  ;;  %v3133_v3 = vld [vmem:[#allocation9 + $0x3ec] sm:$0xf0] }
 0x59d   :  { %2031 = vmatpush.bf16.msra.mxu2 %v2807_v41 }
 0x5a1   :  { %2032 = vmatpush.bf16.msra.mxu2 %v2791_v52 }
 0x5a3   :  { %v2028_v12 = vpop.f32.mrf.mxu1 }
 0x5a4   :  { %v2747_v12 = vor.u32 %v3079_v26, %v2744_v4  ;;  %v2934_v26 = vld [vmem:[#allocation9 + $0x3c0] sm:$0xf]  ;;  %v2951_v4 = vor.u32 %v3133_v3, %v2950_v31  ;;  %v2872_v3 = vld [vmem:[#allocation9 + $0x350] sm:$0xf0] }
 0x5a5   :  { %2033 = vmatpush.bf16.msra.mxu2 %v2775_v18 }
 0x5a8   :  { %2450 = vmatmul.msk.bf16.vlgmr.msrb.gmra.mxu2 %vm153_vm4, %v3785_v39 }
 0x5a9   :  { %2034 = vmatpush.bf16.msra.mxu2 %v2759_v19  ;;  %v3102_v19 = vld [vmem:[#allocation9 + $0x2f4] sm:$0xf0] }
 0x5aa   :  { %v2831_v50 = vor.u32 %v3102_v19, %v2830_v36  ;;  %v2870_v36 = vld [vmem:[#allocation9 + $0x340] sm:$0xf]  ;;  %v3113_v19 = vld [vmem:[#allocation9 + $0x34c] sm:$0xf0] }
 0x5ab   :  { %v2078_v34 = vpop.f32.mrf.mxu1 }
 0x5ac   :  { %v3862_v32 = vadd.f32 %v2078_v34, %v2066_v5  ;;  %v2444_v5 = vld [vmem:[%s3920_s4 + $0x38] sm:$0xf0] }
 0x5ad   :  { %2035 = vmatpush.bf16.msra.mxu2 %v2743_v60  ;;  %v2447_v34 = vor.u32 %v3004_v57, %v2444_v5  ;;  %v2814_v60 = vld [vmem:[#allocation9 + $0x2c8] sm:$0xf]  ;;  %v3092_v57 = vld [vmem:[#allocation9 + $0x2ac] sm:$0xf]  ;;  %v2800_v5 = vld [vmem:[#allocation9 + $0x2b8] sm:$0xf0] }
 0x5af   :  { %1212 = vmatpush.bf16.msra.mxu3 %v2447_v34 }
 0x5b1   :  { %2036 = vmatpush.bf16.msra.mxu2 %v2727_v8  ;;  %v2798_v8 = vld [vmem:[#allocation9 + $0x2a8] sm:$0xf] }
 0x5b3   :  { %v2080_v22 = vpop.f32.mrf.mxu1 }
 0x5b4   :  { %v3075_v22 = vld [vmem:[#allocation9 + $0x224] sm:$0xf] }
 0x5b5   :  { %2037 = vmatpush.bf16.msra.mxu2 %v2711_v20  ;;  %v3086_v20 = vld [vmem:[#allocation9 + $0x274] sm:$0xf0] }
 0x5b9   :  { %2082 = vmatpush.bf16.msrb.mxu2 %v2827_v9  ;;  %v2767_v9 = vor.u32 %v3086_v20, %v2766_v14  ;;  %v3131_v20 = vld [vmem:[#allocation9 + $0x3e4] sm:$0xf] }
 0x5bb   :  { %v2130_v11 = vpop.f32.mrf.mxu1 }
 0x5bc   :  { %v3865_v17 = vadd.f32 %v2130_v11, %v2118_v7  ;;  %v2731_v7 = vor.u32 %v3075_v22, %v2728_v45  ;;  %v3000_v11 = vld [vmem:[%s3920_s4 + $0xc] sm:$0xf]  ;;  %v2918_v22 = vld [vmem:[#allocation9 + $0x3a0] sm:$0xf]  ;;  %v3125_v45 = vld [vmem:[#allocation9 + $0x3ac] sm:$0xf0] }
 0x5bd   :  { %2083 = vmatpush.bf16.msrb.mxu2 %v2811_v48  ;;  %v2431_v27 = vor.u32 %v3000_v11, %v2428_v10  ;;  %v3078_v48 = vld [vmem:[#allocation9 + $0x234] sm:$0xf0]  ;;  %v3088_v11 = vld [vmem:[#allocation9 + $0x28c] sm:$0xf]  ;;  %v2784_v10 = vld [vmem:[#allocation9 + $0x298] sm:$0xf0] }
 0x5bf   :  { %1213 = vmatpush.bf16.msra.mxu3 %v2431_v27  ;;  %v2919_v27 = vor.u32 %v3125_v45, %v2918_v22 }
 0x5c1   :  { %2084 = vmatpush.bf16.msrb.mxu2 %v2795_v49  ;;  %v3074_v49 = vld [vmem:[#allocation9 + $0x214] sm:$0xf0] }
 0x5c2   :  { %v2719_v16 = vor.u32 %v3074_v49, %v2718_v47  ;;  %v2920_v47 = vld [vmem:[#allocation9 + $0x3b0] sm:$0xf0] }
 0x5c3   :  { %v2132_v15 = vpop.f32.mrf.mxu1 }
 0x5c4   :  { %v1048_v15 = vld [vmem:[#allocation2 + $0xa5] ss:$0 sm:$0xff] }
 0x5c5   :  { %2085 = vmatpush.bf16.msrb.mxu2 %v2779_v56  ;;  %v2816_v56 = vld [vmem:[#allocation9 + $0x2d8] sm:$0xf0] }
 0x5c9   :  { %2086 = vmatpush.bf16.msrb.mxu2 %v2763_v63  ;;  %v2819_v63 = vor.u32 %v3096_v13, %v2816_v56  ;;  %v2888_v13 = vld [vmem:[#allocation9 + $0x370] sm:$0xf0]  ;;  %v3111_v56 = vld [vmem:[#allocation9 + $0x344] sm:$0xf] }
 0x5cd   :  { %2087 = vmatpush.bf16.msrb.mxu2 %v2747_v12  ;;  %v3129_v12 = vld [vmem:[#allocation9 + $0x3cc] sm:$0xf0] }
 0x5ce   :  { %v2935_v34 = vor.u32 %v3129_v12, %v2934_v26  ;;  %v2875_v26 = vor.u32 %v3111_v56, %v2872_v3  ;;  %v3103_v12 = vld [vmem:[#allocation9 + $0x304] sm:$0xf]  ;;  %v3120_v3 = vld [vmem:[#allocation9 + $0x38c] sm:$0xf] }
 0x5d1   :  { %2088 = vmatpush.bf16.msrb.mxu2 %v2731_v7  ;;  %v2803_v7 = vor.u32 %v3092_v57, %v2800_v5  ;;  %v2840_v57 = vld [vmem:[#allocation9 + $0x310] sm:$0xf0] }
 0x5d2   :  { %v2843_v5 = vor.u32 %v3103_v12, %v2840_v57  ;;  %v3112_v12 = vld [vmem:[#allocation9 + $0x34c] sm:$0xf]  ;;  %v2880_v57 = vld [vmem:[#allocation9 + $0x358] sm:$0xf0] }
 0x5d5   :  { %2089 = vmatpush.bf16.msrb.mxu2 %v2715_v44  ;;  %v2787_v44 = vor.u32 %v3088_v11, %v2784_v10  ;;  %v3221_v11 = vld [vmem:[#allocation2 + $0xa7] ss:$8 sm:$0xf] }
 0x5d6   :  { %v1122_v10 = vperm.slane %v3221_v11, 3  ;;  %v2848_v11 = vld [vmem:[#allocation9 + $0x318] sm:$0xf0] }
 0x5db   :  { %v2182_v46 = vpop.f32.mrf.mxu1 }
 0x5dc   :  { %v3868_v58 = vadd.f32 %v2182_v46, %v2170_v29  ;;  %v2815_v29 = vor.u32 %v3098_v51, %v2814_v60  ;;  %v2799_v46 = vor.u32 %v3094_v24, %v2798_v8  ;;  %v2736_v60 = vld [vmem:[#allocation9 + $0x238] sm:$0xf0]  ;;  %v2871_v51 = vor.u32 %v3113_v19, %v2870_v36  ;;  %v3072_v24 = vld [vmem:[#allocation9 + $0x20c] sm:$0xf]  ;;  %v2926_v19 = vld [vmem:[#allocation9 + $0x3a8] sm:$0xf] }
 0x5e3   :  { %v2184_v53 = vpop.f32.mrf.mxu1 }
 0x5e4   :  { %v2734_v53 = vld [vmem:[#allocation9 + $0x228] sm:$0xf] }
 0x5e5   :  { %v2735_v33 = vor.u32 %v3078_v48, %v2734_v53  ;;  %v2936_v53 = vld [vmem:[#allocation9 + $0x3d0] sm:$0xf0] }
 0x61b   :  { %v1074_v41 = vpop.f32.mrf.mxu2 }
 0x61c   :  { %v1075_v62 = vadd.f32 %v1074_v41, %v1048_v15  ;;  %v3084_v15 = vld [vmem:[#allocation9 + $0x26c] sm:$0xf]  ;;  %v2768_v41 = vld [vmem:[#allocation9 + $0x278] sm:$0xf0] }
 0x61e   :  { %v1078_v2 = vmax.f32 %v1075_v62, 0.0  ;;  %v2903_v62 = vor.u32 %v3121_v40, %v2902_v43 }
 0x620   :  { %v1082_v52 = vpack.c.bf16 %v1078_v2, %v1078_v2  ;;  %v2886_v2 = vld [vmem:[#allocation9 + $0x360] sm:$0xf] }
 0x622   :  { %2415 = vmatmul.msk.bf16.vlgmr.msrb.gmra.mxu3 %vm1089_vm9, %v1082_v52  ;;  %v3117_v52 = vld [vmem:[#allocation9 + $0x36c] sm:$0xf0] }
 0x623   :  { %v1076_v30 = vpop.f32.mrf.mxu2  ;;  %2043 = vmatpush.bf16.msrb.mxu3 %v2951_v4 }
 0x624   :  { %v2771_v30 = vor.u32 %v3084_v15, %v2768_v41  ;;  %v2958_v15 = vld [vmem:[#allocation9 + $0x3e8] sm:$0xf]  ;;  %v3134_v41 = vld [vmem:[#allocation9 + $0x3f4] sm:$0xf0] }
 0x627   :  { %2044 = vmatpush.bf16.msrb.mxu3 %v2935_v34  ;;  %v1081_v34 = vld [vmem:[#allocation2 + $0xa6] ss:$0 sm:$0xff] }
 0x62b   :  { %v1202_v18 = vpop.f32.mrf.mxu2  ;;  %2045 = vmatpush.bf16.msrb.mxu3 %v2919_v27 }
 0x62c   :  { %v1203_v6 = vadd.f32 %v1202_v18, %v1121_v55  ;;  %v3080_v55 = vld [vmem:[#allocation9 + $0x24c] sm:$0xf]  ;;  %v2752_v18 = vld [vmem:[#allocation9 + $0x258] sm:$0xf0] }
 0x62e   :  { %v1221_v21 = vmax.f32 %v1203_v6, 0.0  ;;  %v2887_v6 = vor.u32 %v3117_v52, %v2886_v2  ;;  %v2959_v2 = vor.u32 %v3134_v41, %v2958_v15 }
 0x62f   :  { %2046 = vmatpush.bf16.msrb.mxu3 %v2903_v62 }
 0x630   :  { %v3883_v25 = vpack.c.bf16 %v1221_v21, %v1221_v21  ;;  %v2755_v21 = vor.u32 %v3080_v55, %v2752_v18  ;;  %v3130_v55 = vld [vmem:[#allocation9 + $0x3d4] sm:$0xf0] }
 0x632   :  { %2451 = vmatmul.msk.bf16.vlgmr.msra.gmra.mxu3 %vm153_vm4, %v3785_v39  ;;  %2038 = vmatmul.bf16.vlgmr.msra.gmra.mxu2 %v3883_v25  ;;  %v2751_v39 = vor.u32 %v3082_v61, %v2750_v42 }
 0x633   :  { %2134 = vmatpush.bf16.msra.mxu2 %v2831_v50  ;;  %v1204_v1 = vpop.f32.mrf.mxu2  ;;  %v3076_v50 = vld [vmem:[#allocation9 + $0x22c] sm:$0xf]  ;;  %2047 = vmatpush.bf16.msrb.mxu3 %v2887_v6 }
 0x634   :  { %v2854_v1 = vld [vmem:[#allocation9 + $0x320] sm:$0xf]  ;;  %v2739_v8 = vor.u32 %v3076_v50, %v2736_v60  ;;  %v3122_v60 = vld [vmem:[#allocation9 + $0x394] sm:$0xf0] }
 0x637   :  { %2135 = vmatpush.bf16.msra.mxu2 %v2815_v29  ;;  %v3109_v29 = vld [vmem:[#allocation9 + $0x32c] sm:$0xf0]  ;;  %2048 = vmatpush.bf16.msrb.mxu3 %v2871_v51 }
 0x638   :  { %v2855_v28 = vor.u32 %v3109_v29, %v2854_v1 }
 0x63b   :  { %2136 = vmatpush.bf16.msra.mxu2 %v2799_v46  ;;  %v2720_v46 = vld [vmem:[#allocation9 + $0x218] sm:$0xf0]  ;;  %2049 = vmatpush.bf16.msrb.mxu3 %v2855_v28  ;;  %v2878_v28 = vld [vmem:[#allocation9 + $0x348] sm:$0xf] }
 0x63c   :  { %v2723_v14 = vor.u32 %v3072_v24, %v2720_v46  ;;  %v3118_v24 = vld [vmem:[#allocation9 + $0x374] sm:$0xf0] }
 0x63f   :  { %2137 = vmatpush.bf16.msra.mxu2 %v2783_v37  ;;  %v3105_v37 = vld [vmem:[#allocation9 + $0x30c] sm:$0xf0] }
 0x640   :  { %v2839_v42 = vor.u32 %v3105_v37, %v2838_v59  ;;  %v3114_v59 = vld [vmem:[#allocation9 + $0x354] sm:$0xf0] }
 0x642   :  { %2090 = vmatmul.bf16.vlgmr.msrb.gmra.mxu2 %v3883_v25  ;;  %2050 = vmatpush.bf16.msrb.mxu3 %v2839_v42 }
 0x643   :  { %2138 = vmatpush.bf16.msra.mxu2 %v2767_v9  ;;  %v2952_v9 = vld [vmem:[#allocation9 + $0x3f0] sm:$0xf0] }
 0x644   :  { %v2955_v61 = vor.u32 %v3131_v20, %v2952_v9  ;;  %v2862_v20 = vld [vmem:[#allocation9 + $0x328] sm:$0xf]  ;;  %v3110_v9 = vld [vmem:[#allocation9 + $0x334] sm:$0xf0] }
 0x645   :  { %v2863_v42 = vor.u32 %v3110_v9, %v2862_v20 }
 0x646   :  { %2095 = vmatpush.bf16.msra.mxu3 %v2955_v61  ;;  %v2846_v61 = vld [vmem:[#allocation9 + $0x308] sm:$0xf] }
 0x647   :  { %2139 = vmatpush.bf16.msra.mxu2 %v2751_v39  ;;  %v3127_v39 = vld [vmem:[#allocation9 + $0x3c4] sm:$0xf] }
 0x648   :  { %v2939_v48 = vor.u32 %v3127_v39, %v2936_v53  ;;  %v3106_v39 = vld [vmem:[#allocation9 + $0x314] sm:$0xf0]  ;;  %v3132_v53 = vld [vmem:[#allocation9 + $0x3ec] sm:$0xf] }
 0x64a   :  { %2096 = vmatpush.bf16.msra.mxu3 %v2939_v48 }
 0x64b   :  { %2140 = vmatpush.bf16.msra.mxu2 %v2735_v33  ;;  %v3123_v33 = vld [vmem:[#allocation9 + $0x3a4] sm:$0xf] }
 0x64c   :  { %v2923_v49 = vor.u32 %v3123_v33, %v2920_v47  ;;  %v2847_v33 = vor.u32 %v3106_v39, %v2846_v61 }
 0x64e   :  { %2097 = vmatpush.bf16.msra.mxu3 %v2923_v49 }
 0x64f   :  { %2141 = vmatpush.bf16.msra.mxu2 %v2719_v16  ;;  %v2907_v16 = vor.u32 %v3119_v23, %v2904_v38  ;;  %v3128_v23 = vld [vmem:[#allocation9 + $0x3cc] sm:$0xf]  ;;  %v2944_v38 = vld [vmem:[#allocation9 + $0x3d8] sm:$0xf0] }
 0x652   :  { %2142 = vmatmul.bf16.vlgmr.msra.gmra.mxu2 %v3883_v25  ;;  %2098 = vmatpush.bf16.msra.mxu3 %v2907_v16  ;;  %v2947_v16 = vor.u32 %v3128_v23, %v2944_v38 }
 0x653   :  { %2186 = vmatpush.bf16.msrb.mxu2 %v2835_v0  ;;  %v3115_v0 = vld [vmem:[#allocation9 + $0x364] sm:$0xf] }
 0x654   :  { %v2891_v31 = vor.u32 %v3115_v0, %v2888_v13  ;;  %v3124_v0 = vld [vmem:[#allocation9 + $0x3ac] sm:$0xf]  ;;  %v2928_v13 = vld [vmem:[#allocation9 + $0x3b8] sm:$0xf0] }
 0x656   :  { %2099 = vmatpush.bf16.msra.mxu3 %v2891_v31  ;;  %v2931_v31 = vor.u32 %v3124_v0, %v2928_v13 }
 0x657   :  { %2187 = vmatpush.bf16.msrb.mxu2 %v2819_v63  ;;  %v2856_v63 = vld [vmem:[#allocation9 + $0x330] sm:$0xf0] }
 0x65a   :  { %2100 = vmatpush.bf16.msra.mxu3 %v2875_v26  ;;  %v2912_v26 = vld [vmem:[#allocation9 + $0x398] sm:$0xf0] }
 0x65b   :  { %2188 = vmatpush.bf16.msrb.mxu2 %v2803_v7 }
 0x65f   :  { %2189 = vmatpush.bf16.msrb.mxu2 %v2787_v44 }
 0x663   :  { %2190 = vmatpush.bf16.msrb.mxu2 %v2771_v30  ;;  %v2942_v30 = vld [vmem:[#allocation9 + $0x3c8] sm:$0xf] }
 0x664   :  { %v2943_v36 = vor.u32 %v3130_v55, %v2942_v30 }
 0x667   :  { %2191 = vmatpush.bf16.msrb.mxu2 %v2755_v21  ;;  %v3126_v21 = vld [vmem:[#allocation9 + $0x3b4] sm:$0xf0] }
 0x668   :  { %v2927_v50 = vor.u32 %v3126_v21, %v2926_v19 }
 0x66b   :  { %2192 = vmatpush.bf16.msrb.mxu2 %v2739_v8  ;;  %v2894_v8 = vld [vmem:[#allocation9 + $0x368] sm:$0xf] }
 0x66c   :  { %v2895_v46 = vor.u32 %v3118_v24, %v2894_v8 }
 0x66f   :  { %2193 = vmatpush.bf16.msrb.mxu2 %v2723_v14  ;;  %v2879_v14 = vor.u32 %v3114_v59, %v2878_v28 }
 0x672   :  { %2194 = vmatmul.bf16.vlgmr.msrb.gmra.mxu2 %v3883_v25  ;;  %v3107_v25 = vld [vmem:[#allocation9 + $0x324] sm:$0xf] }
 0x673   :  { %v2859_v4 = vor.u32 %v3107_v25, %v2856_v63  ;;  %v2915_v25 = vor.u32 %v3120_v3, %v2912_v26  ;;  %v3116_v63 = vld [vmem:[#allocation9 + $0x36c] sm:$0xf] }
 0x675   :  { %2101 = vmatpush.bf16.msra.mxu3 %v2859_v4  ;;  %v2896_v4 = vld [vmem:[#allocation9 + $0x378] sm:$0xf0] }
 0x679   :  { %2102 = vmatpush.bf16.msra.mxu3 %v2843_v5  ;;  %v2883_v5 = vor.u32 %v3112_v12, %v2880_v57 }
 0x6a5   :  { %v1102_v22 = vpop.f32.mrf.mxu3 }
 0x6a6   :  { %v1103_v45 = vadd.f32 %v1102_v22, %v1081_v34  ;;  %v3108_v34 = vld [vmem:[#allocation9 + $0x32c] sm:$0xf]  ;;  %v2864_v22 = vld [vmem:[#allocation9 + $0x338] sm:$0xf0] }
 0x6a8   :  { %2228 = vrot.lane.b32.xlu1 %v1103_v45, %s3343_s14  ;;  %v2867_v45 = vor.u32 %v3108_v34, %v2864_v22 }
 0x6ad   :  { %v1104_v7 = vpop.f32.mrf.mxu3 }
 0x6ae   :  { %v3104_v7 = vld [vmem:[#allocation9 + $0x30c] sm:$0xf] }
 0x6b5   :  { %v1215_v27 = vpop.f32.mrf.mxu3  ;;  %v2039_v43 = vpop.f32.mrf.mxu2 }
 0x6b6   :  { %v1216_v40 = vadd.f32 %v1215_v27, %v1122_v10  ;;  %v3893_v44 = vadd.f32 %v2039_v43, %v3857_v35  ;;  %v2910_v35 = vld [vmem:[#allocation9 + $0x388] sm:$0xf]  ;;  %v2851_v27 = vor.u32 %v3104_v7, %v2848_v11 }
 0x6b7   :  { %v2911_v1 = vor.u32 %v3122_v60, %v2910_v35 }
 0x6b8   :  { %v1222_v62 = vmax.f32 %v1216_v40, 0.0 }
 0x6ba   :  { %v3895_v52 = vpack.c.bf16 %v1222_v62, %v1222_v62 }
 0x6bc   :  { %2051 = vmatmul.bf16.vlgmr.msrb.gmra.mxu3 %v3895_v52 }
 0x6bd   :  { %2147 = vmatpush.bf16.msrb.mxu3 %v2959_v2  ;;  %v1217_v18 = vpop.f32.mrf.mxu3  ;;  %v2041_v6 = vpop.f32.mrf.mxu2 }
 0x6c1   :  { %2148 = vmatpush.bf16.msrb.mxu3 %v2943_v36 }
 0x6c5   :  { %2149 = vmatpush.bf16.msrb.mxu3 %v2927_v50  ;;  %v2091_v51 = vpop.f32.mrf.mxu2 }
 0x6c6   :  { %v3899_v29 = vadd.f32 %v2091_v51, %v3862_v32  ;;  %v2960_v32 = vld [vmem:[#allocation9 + $0x3f8] sm:$0xf0] }
 0x6c7   :  { %v2963_v49 = vor.u32 %v3132_v53, %v2960_v32 }
 0x6c9   :  { %2150 = vmatpush.bf16.msrb.mxu3 %v2911_v1 }
 0x6cc   :  { %2103 = vmatmul.bf16.vlgmr.msra.gmra.mxu3 %v3895_v52 }
 0x6cd   :  { %2151 = vmatpush.bf16.msrb.mxu3 %v2895_v46  ;;  %v2093_v37 = vpop.f32.mrf.mxu2 }
 0x6d1   :  { %2152 = vmatpush.bf16.msrb.mxu3 %v2879_v14 }
 0x6d5   :  { %2153 = vmatpush.bf16.msrb.mxu3 %v2863_v42  ;;  %v2143_v48 = vpop.f32.mrf.mxu2 }
 0x6d6   :  { %v2144_v47 = vadd.f32 %v2143_v48, %v3865_v17  ;;  %v2899_v17 = vor.u32 %v3116_v63, %v2896_v4 }
 0x6d9   :  { %2154 = vmatpush.bf16.msrb.mxu3 %v2847_v33 }
 0x6dc   :  { %2155 = vmatmul.bf16.vlgmr.msrb.gmra.mxu3 %v3895_v52 }
 0x6dd   :  { %2199 = vmatpush.bf16.msra.mxu3 %v2963_v49  ;;  %v2145_v56 = vpop.f32.mrf.mxu2 }
 0x6e1   :  { %2200 = vmatpush.bf16.msra.mxu3 %v2947_v16 }
 0x6e5   :  { %2201 = vmatpush.bf16.msra.mxu3 %v2931_v31 }
 0x6e9   :  { %2202 = vmatpush.bf16.msra.mxu3 %v2915_v25 }
 0x6ed   :  { %2203 = vmatpush.bf16.msra.mxu3 %v2899_v17 }
 0x6f1   :  { %2204 = vmatpush.bf16.msra.mxu3 %v2883_v5 }
 0x6f5   :  { %v2195_v10 = vpop.f32.mrf.mxu2  ;;  %2205 = vmatpush.bf16.msra.mxu3 %v2867_v45 }
 0x6f6   :  { %v2196_v43 = vadd.f32 %v2195_v10, %v3868_v58 }
 0x6f9   :  { %2206 = vmatpush.bf16.msra.mxu3 %v2851_v27 }
 0x6fc   :  { %2207 = vmatmul.bf16.vlgmr.msra.gmra.mxu3 %v3895_v52 }
 0x6fd   :  { %v2197_v40 = vpop.f32.mrf.mxu2 }
 0x71a   :  { %v2229_v15 = vpop.permute.xlu1 %2228 }
 0x71b   :  { %v2231_v41 = vsel %vm153_vm4, %v3412_v54, %v2229_v15 }
 0x71c   :  { %v2233_v62 = vsel %vm2232_vm10, %v2231_v41, 0.0 }
 0x71d   :  { %2234 = vst [vmem:[%s3922_s6] sm:$0x3] %v2233_v62 }
 0x73f   :  { %v2052_v2 = vpop.f32.mrf.mxu3 }
 0x740   :  { %v2053_v58 = vadd.f32 %v2052_v2, %v3893_v44 }
 0x747   :  { %v2054_v30 = vpop.f32.mrf.mxu3 }
 0x74f   :  { %v2104_v55 = vpop.f32.mrf.mxu3 }
 0x750   :  { %v2105_v18 = vadd.f32 %v2104_v55, %v3899_v29 }
 0x752   :  { %v2216_v52 = vrot.slane %v2105_v18, 6 }
 0x754   :  { %v2220_v6 = vsel %vm2219_vm11, %v2053_v58, %v2216_v52 }
 0x757   :  { %v2106_v36 = vpop.f32.mrf.mxu3 }
 0x75f   :  { %v2156_v19 = vpop.f32.mrf.mxu3 }
 0x760   :  { %v2157_v50 = vadd.f32 %v2156_v19, %v2144_v47 }
 0x762   :  { %v2217_v60 = vrot.slane %v2157_v50, 4 }
 0x767   :  { %v2158_v21 = vpop.f32.mrf.mxu3 }
 0x77f   :  { %v2208_v54 = vpop.f32.mrf.mxu3 }
 0x780   :  { %v2209_v35 = vadd.f32 %v2208_v54, %v2196_v43 }
 0x782   :  { %v2218_v51 = vrot.slane %v2209_v35, 2 }
 0x784   :  { %v2222_v1 = vsel %vm2221_vm12, %v2217_v60, %v2218_v51 }
 0x785   :  { %v2224_v44 = vsel %vm2223_vm13, %v2220_v6, %v2222_v1 }
 0x786   :  { %2226 = vst [vmem:[#allocation10] sm:$0xff] %v2224_v44 }
 0x787   :  { %v2210_v29 = vpop.f32.mrf.mxu3  ;;  %2247 = dma.vmem_to_hbm [thread:$0]  %s2243_s20, 128, %s2245_s22, [#allocation4]  }
 0x788   :  { %3336 = dma.done.wait [#allocation4], 128  }
 0x789   :  { %3337 = vsyncadd [#allocation4], 4294967168 }
 0x78a   :  { %2254 = vsyncpa [#allocation3], 1 }
 0x78b   :  { %2255 = vsyncpa [#allocation8], 1 }
 0x78c   :  { %2256 = vsyncpa [#allocation4], 1 }
 0x78d   :  { %2257 = vsyncpa [#allocation5], 1 }

</bundles_post_ra>
